<compile_context>
chip_gen: v7x
topology: tpu7x:2x2x1
jax: 0.10.0
libtpu: 0.0.40
codegen_flags: <defaults>
</compile_context>

<pallas_src>
import functools
import math

import jax
import jax.numpy as jnp
from jax.experimental import pallas as pl
from jax.experimental.pallas import tpu as pltpu


def _text_encoder_kernel(eot_ref,                       # scalar-prefetch: (B,) int32 in SMEM
                         x_ref, pos_ref,
                         ln1_w_ref, ln1_b_ref, w_qkv_ref, b_qkv_ref,
                         w_o_ref, b_o_ref, ln2_w_ref, ln2_b_ref,
                         w_fc_ref, b_fc_ref, w_pr_ref, b_pr_ref,
                         lnf_w_ref, lnf_b_ref, w_proj_ref,
                         out_ref, x_scr,
                         *, num_heads):
    b = pl.program_id(0)                 # batch element  ("parallel")
    l = pl.program_id(1)                 # transformer layer ("arbitrary", innermost)
    n_layers = pl.num_programs(1)

    L, D = x_scr.shape
    H = num_heads
    Dh = D // H
    f32, bf16 = jnp.float32, jnp.bfloat16

    def layer_norm(h, w, bias):
        mu = jnp.mean(h, axis=-1, keepdims=True)
        hc = h - mu
        var = jnp.mean(hc * hc, axis=-1, keepdims=True)
        return hc * jax.lax.rsqrt(var + 1e-5) * w + bias        # rsqrt -> EUP slot

    def mm(a, w):
        # bf16 operands on the MXU, f32 accumulate; elementwise math stays f32.
        return jnp.dot(a.astype(bf16), w.astype(bf16),
                       preferred_element_type=f32)

    # ---- layer-0 init: x = prompts[b] + positional_embedding ----
    @pl.when(l == 0)
    def _():
        x_scr[...] = x_ref[...] + pos_ref[...]

    x = x_scr[...]                                              # (L, D) f32 carry

    # Additive causal mask, built once per grid step (not per head).
    ri = jax.lax.broadcasted_iota(jnp.int32, (L, L), 0)
    ci = jax.lax.broadcasted_iota(jnp.int32, (L, L), 1)
    mask_add = jnp.where(ci <= ri, 0.0, -1e9).astype(f32)

    # ---- multi-head causal self-attention (1/sqrt(Dh) folded into W_q / b_q) ----
    h = layer_norm(x, ln1_w_ref[...], ln1_b_ref[...])
    qkv = mm(h, w_qkv_ref[...]) + b_qkv_ref[...]                # (L, 3D) f32

    head_outs = []
    for hh in range(H):
        q = qkv[:, 0 * D + hh * Dh: 0 * D + (hh + 1) * Dh]
        k = qkv[:, 1 * D + hh * Dh: 1 * D + (hh + 1) * Dh]
        v = qkv[:, 2 * D + hh * Dh: 2 * D + (hh + 1) * Dh]
        s = jax.lax.dot_general(q.astype(bf16), k.astype(bf16),
                                (((1,), (1,)), ((), ())),
                                preferred_element_type=f32)     # (L, L), scale in W_q
        s = s + mask_add
        m = jnp.max(s, axis=-1, keepdims=True)
        e = jnp.exp(s - m)
        denom = jnp.sum(e, axis=-1, keepdims=True)
        p = e * pl.reciprocal(denom, approx=False)              # exact EUP path
        head_outs.append(jnp.dot(p.astype(bf16), v.astype(bf16),
                                 preferred_element_type=f32))   # (L, Dh)
    attn = jnp.concatenate(head_outs, axis=-1)                  # (L, D), values only
    x = x + mm(attn, w_o_ref[...]) + b_o_ref[...]

    # ---- MLP with QuickGELU (x * sigmoid(1.702 x)), as in CLIP ----
    h2 = layer_norm(x, ln2_w_ref[...], ln2_b_ref[...])
    m1 = mm(h2, w_fc_ref[...]) + b_fc_ref[...]
    m1 = m1 * jax.nn.sigmoid(1.702 * m1)
    x = x + mm(m1, w_pr_ref[...]) + b_pr_ref[...]

    x_scr[...] = x                                              # carry to next layer

    # ---- epilogue on the last layer: ln_final, EOT gather, text projection ----
    @pl.when(l == n_layers - 1)
    def _():
        # One-hot over this batch's L rows, driven by the SMEM-prefetched argmax index.
        sel = (jax.lax.broadcasted_iota(jnp.int32, (1, L), 1)
               == eot_ref[b]).astype(f32)                       # (1, L)
        feat = jnp.dot(sel, x, preferred_element_type=f32)      # (1, D) EOT row
        y = layer_norm(feat, lnf_w_ref[...], lnf_b_ref[...])    # ln_final on one row
        proj = mm(y, w_proj_ref[...])                           # (1, P_pad), lane-dense
        # Sublane-aligned (8, 128) unmasked store; wrapper keeps row 0 / first P lanes.
        out_ref[...] = jnp.broadcast_to(proj, out_ref.shape)


def text_encoder_forward(prompts, tokenized_prompts, params, *, n_heads):
    """Pallas version of TextEncoder.forward(prompts, tokenized_prompts).

    prompts:           (B, L, D) already-embedded prompt tokens (if_embedding=True).
    tokenized_prompts: (B, L)    int token ids; argmax(-1) marks the EOT position.
    Returns (B, P) projected text features.
    """
    B, L, D = prompts.shape
    assert D % n_heads == 0
    Dh = D // n_heads
    NL = params["w_qkv"].shape[0]
    P = params["text_proj"].shape[1]
    P_pad = ((P + 127) // 128) * 128

    # ---- wrapper-side layout / dtype plumbing (pure JAX, cheap) ----
    eot = jnp.argmax(tokenized_prompts, axis=-1).astype(jnp.int32)   # SMEM prefetch
    x = prompts.astype(jnp.float32)
    pos = params["pos_emb"].astype(jnp.float32)                      # raw (L, D) table

    # Fold the attention scale into the Q third of the fused QKV projection.
    scale = 1.0 / math.sqrt(Dh)
    qscale = jnp.concatenate(
        [jnp.full((D,), scale, jnp.float32), jnp.ones((2 * D,), jnp.float32)], 0)
    # Weights stored bf16 (half the DMA / VMEM); biases + LN params stay f32.
    w_qkv = (params["w_qkv"] * qscale[None, None, :]).astype(jnp.bfloat16)
    b_qkv = (params["b_qkv"] * qscale[None, None, :]).astype(jnp.float32)
    w_o = params["w_o"].astype(jnp.bfloat16)
    w_fc = params["w_fc"].astype(jnp.bfloat16)
    w_pr = params["w_pr"].astype(jnp.bfloat16)
    w_proj = jnp.pad(params["text_proj"],
                     ((0, 0), (0, P_pad - P))).astype(jnp.bfloat16)  # lane-dense out

    ln1_w = params["ln1_w"].astype(jnp.float32)
    ln1_b = params["ln1_b"].astype(jnp.float32)
    b_o = params["b_o"].astype(jnp.float32)
    ln2_w = params["ln2_w"].astype(jnp.float32)
    ln2_b = params["ln2_b"].astype(jnp.float32)
    b_fc = params["b_fc"].astype(jnp.float32)
    b_pr = params["b_pr"].astype(jnp.float32)
    lnf_w = params["lnf_w"].astype(jnp.float32)
    lnf_b = params["lnf_b"].astype(jnp.float32)

    def layer_spec(arr):
        # One layer's slab per grid step, streamed along the layer axis.
        return pl.BlockSpec((None,) + tuple(arr.shape[1:]),
                            lambda b, l, e: (l, 0, 0))

    in_specs = [
        pl.BlockSpec((None, L, D), lambda b, l, e: (b, 0, 0)),       # prompts[b]
        pl.BlockSpec((L, D), lambda b, l, e: (0, 0)),                # pos_emb (once)
        layer_spec(ln1_w), layer_spec(ln1_b),
        layer_spec(w_qkv), layer_spec(b_qkv),
        layer_spec(w_o), layer_spec(b_o),
        layer_spec(ln2_w), layer_spec(ln2_b),
        layer_spec(w_fc), layer_spec(b_fc),
        layer_spec(w_pr), layer_spec(b_pr),
        pl.BlockSpec((1, D), lambda b, l, e: (0, 0)),                # lnf_w
        pl.BlockSpec((1, D), lambda b, l, e: (0, 0)),                # lnf_b
        pl.BlockSpec((D, P_pad), lambda b, l, e: (0, 0)),            # text_projection
    ]
    out_spec = pl.BlockSpec((None, 8, P_pad), lambda b, l, e: (b, 0, 0))

    kernel = functools.partial(_text_encoder_kernel, num_heads=n_heads)

    out = pl.pallas_call(
        kernel,
        out_shape=jax.ShapeDtypeStruct((B, 8, P_pad), jnp.float32),
        grid_spec=pltpu.PrefetchScalarGridSpec(
            num_scalar_prefetch=1,
            grid=(B, NL),                              # batch parallel, layer streamed
            in_specs=in_specs,
            out_specs=out_spec,
            scratch_shapes=[pltpu.VMEM((L, D), jnp.float32)]),   # x carried per batch
        compiler_params=pltpu.CompilerParams(
            dimension_semantics=("parallel", "arbitrary"),
            vmem_limit_bytes=32 * 1024 * 1024),
    )(eot, x, pos,
      ln1_w, ln1_b, w_qkv, b_qkv, w_o, b_o, ln2_w, ln2_b,
      w_fc, b_fc, w_pr, b_pr, lnf_w, lnf_b, w_proj)

    return out[:, 0, :P]


def _reference_forward(prompts, tokenized_prompts, params, *, n_heads):
    """Pure-JAX reference mirroring the PyTorch TextEncoder.forward default path."""
    hp = jax.lax.Precision.HIGHEST
    x = prompts + params["pos_emb"][None]
    B, L, D = x.shape
    Dh = D // n_heads
    n_layers = params["w_qkv"].shape[0]
    causal = jnp.tril(jnp.ones((L, L), bool))

    def ln(h, w, b):
        mu = jnp.mean(h, -1, keepdims=True)
        hc = h - mu
        var = jnp.mean(hc * hc, -1, keepdims=True)
        return hc * jax.lax.rsqrt(var + 1e-5) * w + b

    for l in range(n_layers):
        h = ln(x, params["ln1_w"][l], params["ln1_b"][l])
        qkv = jnp.einsum("bld,de->ble", h, params["w_qkv"][l],
                         precision=hp) + params["b_qkv"][l]
        q, k, v = jnp.split(qkv, 3, axis=-1)
        q = q.reshape(B, L, n_heads, Dh)
        k = k.reshape(B, L, n_heads, Dh)
        v = v.reshape(B, L, n_heads, Dh)
        s = jnp.einsum("bqhd,bkhd->bhqk", q, k, precision=hp) / math.sqrt(Dh)
        s = jnp.where(causal[None, None], s, -1e9)
        p = jax.nn.softmax(s, axis=-1)
        o = jnp.einsum("bhqk,bkhd->bqhd", p, v, precision=hp).reshape(B, L, D)
        x = x + jnp.einsum("bld,de->ble", o, params["w_o"][l],
                           precision=hp) + params["b_o"][l]
        h2 = ln(x, params["ln2_w"][l], params["ln2_b"][l])
        m1 = jnp.einsum("bld,de->ble", h2, params["w_fc"][l],
                        precision=hp) + params["b_fc"][l]
        m1 = m1 * jax.nn.sigmoid(1.702 * m1)
        x = x + jnp.einsum("bld,de->ble", m1, params["w_pr"][l],
                           precision=hp) + params["b_pr"][l]

    y = ln(x, params["lnf_w"], params["lnf_b"])
    eot = jnp.argmax(tokenized_prompts, axis=-1)
    feats = y[jnp.arange(B), eot]
    return jnp.dot(feats, params["text_proj"], precision=hp)


if __name__ == "__main__":
    # Small shapes consistent with the module: batch B=2, sequence L=8, width D=32,
    # 4 attention heads, 2 transformer layers, projection dim P=32.
    B, L, D, H, NL, P = 2, 8, 32, 4, 2, 32

    key = jax.random.PRNGKey(0)
    ks = jax.random.split(key, 16)

    def nrm(k, shape, s):
        return s * jax.random.normal(k, shape, jnp.float32)

    # Already-embedded prompts (if_embedding=True path) and token ids whose argmax
    # marks the EOT position (CLIP's EOT id 49407 is the largest token id).
    prompts = nrm(ks[0], (B, L, D), 0.1)
    tokenized = jax.random.randint(ks[1], (B, L), 1, 400, dtype=jnp.int32)
    eot_pos = jnp.array([5, 7], dtype=jnp.int32)
    tokenized = tokenized.at[jnp.arange(B), eot_pos].set(49407)

    # Synthesized "pretrained" CLIP text-tower parameters (math layout: (in, out)).
    params = {
        "pos_emb": nrm(ks[2], (L, D), 0.01),
        "ln1_w": 1.0 + nrm(ks[3], (NL, 1, D), 0.05),
        "ln1_b": nrm(ks[4], (NL, 1, D), 0.01),
        "w_qkv": nrm(ks[5], (NL, D, 3 * D), 0.05),
        "b_qkv": nrm(ks[6], (NL, 1, 3 * D), 0.01),
        "w_o":   nrm(ks[7], (NL, D, D), 0.05),
        "b_o":   nrm(ks[8], (NL, 1, D), 0.01),
        "ln2_w": 1.0 + nrm(ks[9], (NL, 1, D), 0.05),
        "ln2_b": nrm(ks[10], (NL, 1, D), 0.01),
        "w_fc":  nrm(ks[11], (NL, D, 4 * D), 0.05),
        "b_fc":  nrm(ks[12], (NL, 1, 4 * D), 0.01),
        "w_pr":  nrm(ks[13], (NL, 4 * D, D), 0.05),
        "b_pr":  nrm(ks[14], (NL, 1, D), 0.01),
        "lnf_w": jnp.ones((1, D), jnp.float32),
        "lnf_b": jnp.zeros((1, D), jnp.float32),
        "text_proj": nrm(ks[15], (D, P), 0.05),
    }

    out = text_encoder_forward(prompts, tokenized, params, n_heads=H)
    out = jax.block_until_ready(out)

    ref = _reference_forward(prompts, tokenized, params, n_heads=H)
    assert out.shape == (B, P)
    # Tolerance covers bf16 MXU operands (weights + activations cast to bf16 for the
    # matmuls; accumulation and all elementwise math stay f32).
    err = float(jnp.max(jnp.abs(out - ref)))
    assert jnp.allclose(out, ref, atol=2e-2, rtol=2e-2), f"max abs err {err}"

    print("KERNEL_OK")
</pallas_src>

<mosaic_0001>
module attributes {stable_mosaic.version = 11 : i64} {
  func.func @_text_encoder_kernel(%arg0: i32, %arg1: i32, %arg2: memref<2xi32, #tpu.memory_space<smem>>, %arg3: memref<1x8x32xf32, #tpu.memory_space<vmem>>, %arg4: memref<8x32xf32, #tpu.memory_space<vmem>>, %arg5: memref<1x1x32xf32, #tpu.memory_space<vmem>>, %arg6: memref<1x1x32xf32, #tpu.memory_space<vmem>>, %arg7: memref<1x32x96xbf16, #tpu.memory_space<vmem>>, %arg8: memref<1x1x96xf32, #tpu.memory_space<vmem>>, %arg9: memref<1x32x32xbf16, #tpu.memory_space<vmem>>, %arg10: memref<1x1x32xf32, #tpu.memory_space<vmem>>, %arg11: memref<1x1x32xf32, #tpu.memory_space<vmem>>, %arg12: memref<1x1x32xf32, #tpu.memory_space<vmem>>, %arg13: memref<1x32x128xbf16, #tpu.memory_space<vmem>>, %arg14: memref<1x1x128xf32, #tpu.memory_space<vmem>>, %arg15: memref<1x128x32xbf16, #tpu.memory_space<vmem>>, %arg16: memref<1x1x32xf32, #tpu.memory_space<vmem>>, %arg17: memref<1x32xf32, #tpu.memory_space<vmem>>, %arg18: memref<1x32xf32, #tpu.memory_space<vmem>>, %arg19: memref<32x128xbf16, #tpu.memory_space<vmem>>, %arg20: memref<1x8x128xf32, #tpu.memory_space<vmem>>, %arg21: memref<8x32xf32, #tpu.memory_space<vmem>>) attributes {dimension_semantics = [#tpu.dimension_semantics<parallel>, #tpu.dimension_semantics<arbitrary>], iteration_bounds = array<i64: 2, 2>, scalar_prefetch = 1 : i64, scratch_operands = 1 : i64, tpu.core_type = #tpu.core_type<tc>, window_params = [{transform_indices = @transform_0, window_bounds = array<i64: 1, 8, 32>}, {pipeline_mode = #tpu.pipeline_mode<synchronous>, transform_indices = @transform_1, window_bounds = array<i64: 8, 32>}, {transform_indices = @transform_2, window_bounds = array<i64: 1, 1, 32>}, {transform_indices = @transform_3, window_bounds = array<i64: 1, 1, 32>}, {transform_indices = @transform_4, window_bounds = array<i64: 1, 32, 96>}, {transform_indices = @transform_5, window_bounds = array<i64: 1, 1, 96>}, {transform_indices = @transform_6, window_bounds = array<i64: 1, 32, 32>}, {transform_indices = @transform_7, window_bounds = array<i64: 1, 1, 32>}, {transform_indices = @transform_8, window_bounds = array<i64: 1, 1, 32>}, {transform_indices = @transform_9, window_bounds = array<i64: 1, 1, 32>}, {transform_indices = @transform_10, window_bounds = array<i64: 1, 32, 128>}, {transform_indices = @transform_11, window_bounds = array<i64: 1, 1, 128>}, {transform_indices = @transform_12, window_bounds = array<i64: 1, 128, 32>}, {transform_indices = @transform_13, window_bounds = array<i64: 1, 1, 32>}, {pipeline_mode = #tpu.pipeline_mode<synchronous>, transform_indices = @transform_14, window_bounds = array<i64: 1, 32>}, {pipeline_mode = #tpu.pipeline_mode<synchronous>, transform_indices = @transform_15, window_bounds = array<i64: 1, 32>}, {pipeline_mode = #tpu.pipeline_mode<synchronous>, transform_indices = @transform_16, window_bounds = array<i64: 32, 128>}, {transform_indices = @transform_17, window_bounds = array<i64: 1, 8, 128>}]} {
    %c0_i32 = arith.constant 0 : i32
    %0 = arith.cmpi eq, %arg1, %c0_i32 : i32
    %1 = arith.extui %0 : i1 to i32
    %c0_i32_0 = arith.constant 0 : i32
    %2 = arith.cmpi ne, %1, %c0_i32_0 : i32
    scf.if %2 {
      %c0_74 = arith.constant 0 : index
      %c0_75 = arith.constant 0 : index
      %c0_76 = arith.constant 0 : index
      %185 = vector.load %arg3[%c0_74, %c0_75, %c0_76] : memref<1x8x32xf32, #tpu.memory_space<vmem>>, vector<1x8x32xf32>
      %186 = vector.shape_cast %185 : vector<1x8x32xf32> to vector<8x32xf32>
      %c0_77 = arith.constant 0 : index
      %c0_78 = arith.constant 0 : index
      %187 = vector.load %arg4[%c0_77, %c0_78] : memref<8x32xf32, #tpu.memory_space<vmem>>, vector<8x32xf32>
      %188 = arith.addf %186, %187 : vector<8x32xf32>
      %c0_79 = arith.constant 0 : index
      %c0_80 = arith.constant 0 : index
      %189 = vector.load %arg21[%c0_79, %c0_80] : memref<8x32xf32, #tpu.memory_space<vmem>>, vector<8x32xf32>
      tpu.vector_store %arg21[%c0_79, %c0_80], %188 {strides = array<i32>} : memref<8x32xf32, #tpu.memory_space<vmem>>, vector<8x32xf32>,
    } else {
    }
    %c0 = arith.constant 0 : index
    %c0_1 = arith.constant 0 : index
    %3 = vector.load %arg21[%c0, %c0_1] : memref<8x32xf32, #tpu.memory_space<vmem>>, vector<8x32xf32>
    %4 = tpu.iota {dimensions = array<i32: 0>} : vector<8x8xi32>
    %5 = tpu.iota {dimensions = array<i32: 1>} : vector<8x8xi32>
    %6 = arith.cmpi sle, %5, %4 : vector<8x8xi32>
    %cst = arith.constant 0.000000e+00 : f32
    %cst_2 = arith.constant -1.000000e+09 : f32
    %7 = vector.broadcast %cst : f32 to vector<8x8xf32>
    %8 = vector.broadcast %cst_2 : f32 to vector<8x8xf32>
    %9 = arith.select %6, %7, %8 : vector<8x8xi1>, vector<8x8xf32>
    %c0_3 = arith.constant 0 : index
    %c0_4 = arith.constant 0 : index
    %c0_5 = arith.constant 0 : index
    %10 = vector.load %arg5[%c0_3, %c0_4, %c0_5] : memref<1x1x32xf32, #tpu.memory_space<vmem>>, vector<1x1x32xf32>
    %11 = vector.shape_cast %10 : vector<1x1x32xf32> to vector<1x32xf32>
    %c0_6 = arith.constant 0 : index
    %c0_7 = arith.constant 0 : index
    %c0_8 = arith.constant 0 : index
    %12 = vector.load %arg6[%c0_6, %c0_7, %c0_8] : memref<1x1x32xf32, #tpu.memory_space<vmem>>, vector<1x1x32xf32>
    %13 = vector.shape_cast %12 : vector<1x1x32xf32> to vector<1x32xf32>
    %cst_9 = arith.constant dense<0.000000e+00> : vector<8xf32>
    %14 = vector.multi_reduction <add>, %3, %cst_9 [1] : vector<8x32xf32> to vector<8xf32>
    %15 = vector.shape_cast %14 : vector<8xf32> to vector<8x1xf32>
    %cst_10 = arith.constant 3.200000e+01 : f32
    %16 = vector.broadcast %cst_10 : f32 to vector<8x1xf32>
    %17 = arith.divf %15, %16 : vector<8x1xf32>
    %18 = vector.broadcast %17 : vector<8x1xf32> to vector<8x32xf32>
    %19 = arith.subf %3, %18 : vector<8x32xf32>
    %20 = arith.mulf %19, %19 : vector<8x32xf32>
    %cst_11 = arith.constant dense<0.000000e+00> : vector<8xf32>
    %21 = vector.multi_reduction <add>, %20, %cst_11 [1] : vector<8x32xf32> to vector<8xf32>
    %22 = vector.shape_cast %21 : vector<8xf32> to vector<8x1xf32>
    %cst_12 = arith.constant 3.200000e+01 : f32
    %23 = vector.broadcast %cst_12 : f32 to vector<8x1xf32>
    %24 = arith.divf %22, %23 : vector<8x1xf32>
    %cst_13 = arith.constant 9.99999974E-6 : f32
    %25 = vector.broadcast %cst_13 : f32 to vector<8x1xf32>
    %26 = arith.addf %24, %25 : vector<8x1xf32>
    %27 = math.rsqrt %26 : vector<8x1xf32>
    %28 = vector.broadcast %27 : vector<8x1xf32> to vector<8x32xf32>
    %29 = arith.mulf %19, %28 : vector<8x32xf32>
    %30 = vector.broadcast %11 : vector<1x32xf32> to vector<8x32xf32>
    %31 = arith.mulf %29, %30 : vector<8x32xf32>
    %32 = vector.broadcast %13 : vector<1x32xf32> to vector<8x32xf32>
    %33 = arith.addf %31, %32 : vector<8x32xf32>
    %c0_14 = arith.constant 0 : index
    %c0_15 = arith.constant 0 : index
    %c0_16 = arith.constant 0 : index
    %34 = vector.load %arg7[%c0_14, %c0_15, %c0_16] : memref<1x32x96xbf16, #tpu.memory_space<vmem>>, vector<1x32x96xbf16>
    %35 = vector.shape_cast %34 : vector<1x32x96xbf16> to vector<32x96xbf16>
    %36 = arith.truncf %33 : vector<8x32xf32> to vector<8x32xbf16>
    %cst_17 = arith.constant dense<0.000000e+00> : vector<8x96xf32>
    %37 = tpu.matmul %36, %35, %cst_17 {dimension_numbers = #tpu.dot_dimension_numbers<[1], [0], [0], [1], [0, 0, 1, 1], [], []>} : vector<8x32xbf16>, vector<32x96xbf16>, vector<8x96xf32> -> vector<8x96xf32>
    %c0_18 = arith.constant 0 : index
    %c0_19 = arith.constant 0 : index
    %c0_20 = arith.constant 0 : index
    %38 = vector.load %arg8[%c0_18, %c0_19, %c0_20] : memref<1x1x96xf32, #tpu.memory_space<vmem>>, vector<1x1x96xf32>
    %39 = vector.shape_cast %38 : vector<1x1x96xf32> to vector<1x96xf32>
    %40 = vector.broadcast %39 : vector<1x96xf32> to vector<8x96xf32>
    %41 = arith.addf %37, %40 : vector<8x96xf32>
    %42 = vector.extract_strided_slice %41 {offsets = [0, 0], sizes = [8, 8], strides = [1, 1]} : vector<8x96xf32> to vector<8x8xf32>
    %43 = vector.extract_strided_slice %41 {offsets = [0, 32], sizes = [8, 8], strides = [1, 1]} : vector<8x96xf32> to vector<8x8xf32>
    %44 = vector.extract_strided_slice %41 {offsets = [0, 64], sizes = [8, 8], strides = [1, 1]} : vector<8x96xf32> to vector<8x8xf32>
    %45 = arith.truncf %42 : vector<8x8xf32> to vector<8x8xbf16>
    %46 = arith.truncf %43 : vector<8x8xf32> to vector<8x8xbf16>
    %cst_21 = arith.constant dense<0.000000e+00> : vector<8x8xf32>
    %47 = tpu.matmul %45, %46, %cst_21 {dimension_numbers = #tpu.dot_dimension_numbers<[1], [1], [0], [0], [0, 0, 1, 0], [], []>} : vector<8x8xbf16>, vector<8x8xbf16>, vector<8x8xf32> -> vector<8x8xf32>
    %48 = arith.addf %47, %9 : vector<8x8xf32>
    %cst_22 = arith.constant dense<0xFF800000> : vector<8xf32>
    %49 = vector.multi_reduction <maximumf>, %48, %cst_22 [1] : vector<8x8xf32> to vector<8xf32>
    %50 = vector.shape_cast %49 : vector<8xf32> to vector<8x1xf32>
    %51 = vector.broadcast %50 : vector<8x1xf32> to vector<8x8xf32>
    %52 = arith.subf %48, %51 : vector<8x8xf32>
    %53 = math.exp %52 : vector<8x8xf32>
    %cst_23 = arith.constant dense<0.000000e+00> : vector<8xf32>
    %54 = vector.multi_reduction <add>, %53, %cst_23 [1] : vector<8x8xf32> to vector<8xf32>
    %55 = vector.shape_cast %54 : vector<8xf32> to vector<8x1xf32>
    %56 = tpu.reciprocal %55 : vector<8x1xf32> -> vector<8x1xf32>
    %57 = vector.broadcast %56 : vector<8x1xf32> to vector<8x8xf32>
    %58 = arith.mulf %53, %57 : vector<8x8xf32>
    %59 = arith.truncf %58 : vector<8x8xf32> to vector<8x8xbf16>
    %60 = arith.truncf %44 : vector<8x8xf32> to vector<8x8xbf16>
    %cst_24 = arith.constant dense<0.000000e+00> : vector<8x8xf32>
    %61 = tpu.matmul %59, %60, %cst_24 {dimension_numbers = #tpu.dot_dimension_numbers<[1], [0], [0], [1], [0, 0, 1, 1], [], []>} : vector<8x8xbf16>, vector<8x8xbf16>, vector<8x8xf32> -> vector<8x8xf32>
    %62 = vector.extract_strided_slice %41 {offsets = [0, 8], sizes = [8, 8], strides = [1, 1]} : vector<8x96xf32> to vector<8x8xf32>
    %63 = vector.extract_strided_slice %41 {offsets = [0, 40], sizes = [8, 8], strides = [1, 1]} : vector<8x96xf32> to vector<8x8xf32>
    %64 = vector.extract_strided_slice %41 {offsets = [0, 72], sizes = [8, 8], strides = [1, 1]} : vector<8x96xf32> to vector<8x8xf32>
    %65 = arith.truncf %62 : vector<8x8xf32> to vector<8x8xbf16>
    %66 = arith.truncf %63 : vector<8x8xf32> to vector<8x8xbf16>
    %cst_25 = arith.constant dense<0.000000e+00> : vector<8x8xf32>
    %67 = tpu.matmul %65, %66, %cst_25 {dimension_numbers = #tpu.dot_dimension_numbers<[1], [1], [0], [0], [0, 0, 1, 0], [], []>} : vector<8x8xbf16>, vector<8x8xbf16>, vector<8x8xf32> -> vector<8x8xf32>
    %68 = arith.addf %67, %9 : vector<8x8xf32>
    %cst_26 = arith.constant dense<0xFF800000> : vector<8xf32>
    %69 = vector.multi_reduction <maximumf>, %68, %cst_26 [1] : vector<8x8xf32> to vector<8xf32>
    %70 = vector.shape_cast %69 : vector<8xf32> to vector<8x1xf32>
    %71 = vector.broadcast %70 : vector<8x1xf32> to vector<8x8xf32>
    %72 = arith.subf %68, %71 : vector<8x8xf32>
    %73 = math.exp %72 : vector<8x8xf32>
    %cst_27 = arith.constant dense<0.000000e+00> : vector<8xf32>
    %74 = vector.multi_reduction <add>, %73, %cst_27 [1] : vector<8x8xf32> to vector<8xf32>
    %75 = vector.shape_cast %74 : vector<8xf32> to vector<8x1xf32>
    %76 = tpu.reciprocal %75 : vector<8x1xf32> -> vector<8x1xf32>
    %77 = vector.broadcast %76 : vector<8x1xf32> to vector<8x8xf32>
    %78 = arith.mulf %73, %77 : vector<8x8xf32>
    %79 = arith.truncf %78 : vector<8x8xf32> to vector<8x8xbf16>
    %80 = arith.truncf %64 : vector<8x8xf32> to vector<8x8xbf16>
    %cst_28 = arith.constant dense<0.000000e+00> : vector<8x8xf32>
    %81 = tpu.matmul %79, %80, %cst_28 {dimension_numbers = #tpu.dot_dimension_numbers<[1], [0], [0], [1], [0, 0, 1, 1], [], []>} : vector<8x8xbf16>, vector<8x8xbf16>, vector<8x8xf32> -> vector<8x8xf32>
    %82 = vector.extract_strided_slice %41 {offsets = [0, 16], sizes = [8, 8], strides = [1, 1]} : vector<8x96xf32> to vector<8x8xf32>
    %83 = vector.extract_strided_slice %41 {offsets = [0, 48], sizes = [8, 8], strides = [1, 1]} : vector<8x96xf32> to vector<8x8xf32>
    %84 = vector.extract_strided_slice %41 {offsets = [0, 80], sizes = [8, 8], strides = [1, 1]} : vector<8x96xf32> to vector<8x8xf32>
    %85 = arith.truncf %82 : vector<8x8xf32> to vector<8x8xbf16>
    %86 = arith.truncf %83 : vector<8x8xf32> to vector<8x8xbf16>
    %cst_29 = arith.constant dense<0.000000e+00> : vector<8x8xf32>
    %87 = tpu.matmul %85, %86, %cst_29 {dimension_numbers = #tpu.dot_dimension_numbers<[1], [1], [0], [0], [0, 0, 1, 0], [], []>} : vector<8x8xbf16>, vector<8x8xbf16>, vector<8x8xf32> -> vector<8x8xf32>
    %88 = arith.addf %87, %9 : vector<8x8xf32>
    %cst_30 = arith.constant dense<0xFF800000> : vector<8xf32>
    %89 = vector.multi_reduction <maximumf>, %88, %cst_30 [1] : vector<8x8xf32> to vector<8xf32>
    %90 = vector.shape_cast %89 : vector<8xf32> to vector<8x1xf32>
    %91 = vector.broadcast %90 : vector<8x1xf32> to vector<8x8xf32>
    %92 = arith.subf %88, %91 : vector<8x8xf32>
    %93 = math.exp %92 : vector<8x8xf32>
    %cst_31 = arith.constant dense<0.000000e+00> : vector<8xf32>
    %94 = vector.multi_reduction <add>, %93, %cst_31 [1] : vector<8x8xf32> to vector<8xf32>
    %95 = vector.shape_cast %94 : vector<8xf32> to vector<8x1xf32>
    %96 = tpu.reciprocal %95 : vector<8x1xf32> -> vector<8x1xf32>
    %97 = vector.broadcast %96 : vector<8x1xf32> to vector<8x8xf32>
    %98 = arith.mulf %93, %97 : vector<8x8xf32>
    %99 = arith.truncf %98 : vector<8x8xf32> to vector<8x8xbf16>
    %100 = arith.truncf %84 : vector<8x8xf32> to vector<8x8xbf16>
    %cst_32 = arith.constant dense<0.000000e+00> : vector<8x8xf32>
    %101 = tpu.matmul %99, %100, %cst_32 {dimension_numbers = #tpu.dot_dimension_numbers<[1], [0], [0], [1], [0, 0, 1, 1], [], []>} : vector<8x8xbf16>, vector<8x8xbf16>, vector<8x8xf32> -> vector<8x8xf32>
    %102 = vector.extract_strided_slice %41 {offsets = [0, 24], sizes = [8, 8], strides = [1, 1]} : vector<8x96xf32> to vector<8x8xf32>
    %103 = vector.extract_strided_slice %41 {offsets = [0, 56], sizes = [8, 8], strides = [1, 1]} : vector<8x96xf32> to vector<8x8xf32>
    %104 = vector.extract_strided_slice %41 {offsets = [0, 88], sizes = [8, 8], strides = [1, 1]} : vector<8x96xf32> to vector<8x8xf32>
    %105 = arith.truncf %102 : vector<8x8xf32> to vector<8x8xbf16>
    %106 = arith.truncf %103 : vector<8x8xf32> to vector<8x8xbf16>
    %cst_33 = arith.constant dense<0.000000e+00> : vector<8x8xf32>
    %107 = tpu.matmul %105, %106, %cst_33 {dimension_numbers = #tpu.dot_dimension_numbers<[1], [1], [0], [0], [0, 0, 1, 0], [], []>} : vector<8x8xbf16>, vector<8x8xbf16>, vector<8x8xf32> -> vector<8x8xf32>
    %108 = arith.addf %107, %9 : vector<8x8xf32>
    %cst_34 = arith.constant dense<0xFF800000> : vector<8xf32>
    %109 = vector.multi_reduction <maximumf>, %108, %cst_34 [1] : vector<8x8xf32> to vector<8xf32>
    %110 = vector.shape_cast %109 : vector<8xf32> to vector<8x1xf32>
    %111 = vector.broadcast %110 : vector<8x1xf32> to vector<8x8xf32>
    %112 = arith.subf %108, %111 : vector<8x8xf32>
    %113 = math.exp %112 : vector<8x8xf32>
    %cst_35 = arith.constant dense<0.000000e+00> : vector<8xf32>
    %114 = vector.multi_reduction <add>, %113, %cst_35 [1] : vector<8x8xf32> to vector<8xf32>
    %115 = vector.shape_cast %114 : vector<8xf32> to vector<8x1xf32>
    %116 = tpu.reciprocal %115 : vector<8x1xf32> -> vector<8x1xf32>
    %117 = vector.broadcast %116 : vector<8x1xf32> to vector<8x8xf32>
    %118 = arith.mulf %113, %117 : vector<8x8xf32>
    %119 = arith.truncf %118 : vector<8x8xf32> to vector<8x8xbf16>
    %120 = arith.truncf %104 : vector<8x8xf32> to vector<8x8xbf16>
    %cst_36 = arith.constant dense<0.000000e+00> : vector<8x8xf32>
    %121 = tpu.matmul %119, %120, %cst_36 {dimension_numbers = #tpu.dot_dimension_numbers<[1], [0], [0], [1], [0, 0, 1, 1], [], []>} : vector<8x8xbf16>, vector<8x8xbf16>, vector<8x8xf32> -> vector<8x8xf32>
    %122 = tpu.concatenate %61, %81, %101, %121 in 1 : vector<8x8xf32>, vector<8x8xf32>, vector<8x8xf32>, vector<8x8xf32> -> vector<8x32xf32>
    %c0_37 = arith.constant 0 : index
    %c0_38 = arith.constant 0 : index
    %c0_39 = arith.constant 0 : index
    %123 = vector.load %arg9[%c0_37, %c0_38, %c0_39] : memref<1x32x32xbf16, #tpu.memory_space<vmem>>, vector<1x32x32xbf16>
    %124 = vector.shape_cast %123 : vector<1x32x32xbf16> to vector<32x32xbf16>
    %125 = arith.truncf %122 : vector<8x32xf32> to vector<8x32xbf16>
    %cst_40 = arith.constant dense<0.000000e+00> : vector<8x32xf32>
    %126 = tpu.matmul %125, %124, %cst_40 {dimension_numbers = #tpu.dot_dimension_numbers<[1], [0], [0], [1], [0, 0, 1, 1], [], []>} : vector<8x32xbf16>, vector<32x32xbf16>, vector<8x32xf32> -> vector<8x32xf32>
    %127 = arith.addf %3, %126 : vector<8x32xf32>
    %c0_41 = arith.constant 0 : index
    %c0_42 = arith.constant 0 : index
    %c0_43 = arith.constant 0 : index
    %128 = vector.load %arg10[%c0_41, %c0_42, %c0_43] : memref<1x1x32xf32, #tpu.memory_space<vmem>>, vector<1x1x32xf32>
    %129 = vector.shape_cast %128 : vector<1x1x32xf32> to vector<1x32xf32>
    %130 = vector.broadcast %129 : vector<1x32xf32> to vector<8x32xf32>
    %131 = arith.addf %127, %130 : vector<8x32xf32>
    %c0_44 = arith.constant 0 : index
    %c0_45 = arith.constant 0 : index
    %c0_46 = arith.constant 0 : index
    %132 = vector.load %arg11[%c0_44, %c0_45, %c0_46] : memref<1x1x32xf32, #tpu.memory_space<vmem>>, vector<1x1x32xf32>
    %133 = vector.shape_cast %132 : vector<1x1x32xf32> to vector<1x32xf32>
    %c0_47 = arith.constant 0 : index
    %c0_48 = arith.constant 0 : index
    %c0_49 = arith.constant 0 : index
    %134 = vector.load %arg12[%c0_47, %c0_48, %c0_49] : memref<1x1x32xf32, #tpu.memory_space<vmem>>, vector<1x1x32xf32>
    %135 = vector.shape_cast %134 : vector<1x1x32xf32> to vector<1x32xf32>
    %cst_50 = arith.constant dense<0.000000e+00> : vector<8xf32>
    %136 = vector.multi_reduction <add>, %131, %cst_50 [1] : vector<8x32xf32> to vector<8xf32>
    %137 = vector.shape_cast %136 : vector<8xf32> to vector<8x1xf32>
    %cst_51 = arith.constant 3.200000e+01 : f32
    %138 = vector.broadcast %cst_51 : f32 to vector<8x1xf32>
    %139 = arith.divf %137, %138 : vector<8x1xf32>
    %140 = vector.broadcast %139 : vector<8x1xf32> to vector<8x32xf32>
    %141 = arith.subf %131, %140 : vector<8x32xf32>
    %142 = arith.mulf %141, %141 : vector<8x32xf32>
    %cst_52 = arith.constant dense<0.000000e+00> : vector<8xf32>
    %143 = vector.multi_reduction <add>, %142, %cst_52 [1] : vector<8x32xf32> to vector<8xf32>
    %144 = vector.shape_cast %143 : vector<8xf32> to vector<8x1xf32>
    %cst_53 = arith.constant 3.200000e+01 : f32
    %145 = vector.broadcast %cst_53 : f32 to vector<8x1xf32>
    %146 = arith.divf %144, %145 : vector<8x1xf32>
    %cst_54 = arith.constant 9.99999974E-6 : f32
    %147 = vector.broadcast %cst_54 : f32 to vector<8x1xf32>
    %148 = arith.addf %146, %147 : vector<8x1xf32>
    %149 = math.rsqrt %148 : vector<8x1xf32>
    %150 = vector.broadcast %149 : vector<8x1xf32> to vector<8x32xf32>
    %151 = arith.mulf %141, %150 : vector<8x32xf32>
    %152 = vector.broadcast %133 : vector<1x32xf32> to vector<8x32xf32>
    %153 = arith.mulf %151, %152 : vector<8x32xf32>
    %154 = vector.broadcast %135 : vector<1x32xf32> to vector<8x32xf32>
    %155 = arith.addf %153, %154 : vector<8x32xf32>
    %c0_55 = arith.constant 0 : index
    %c0_56 = arith.constant 0 : index
    %c0_57 = arith.constant 0 : index
    %156 = vector.load %arg13[%c0_55, %c0_56, %c0_57] : memref<1x32x128xbf16, #tpu.memory_space<vmem>>, vector<1x32x128xbf16>
    %157 = vector.shape_cast %156 : vector<1x32x128xbf16> to vector<32x128xbf16>
    %158 = arith.truncf %155 : vector<8x32xf32> to vector<8x32xbf16>
    %cst_58 = arith.constant dense<0.000000e+00> : vector<8x128xf32>
    %159 = tpu.matmul %158, %157, %cst_58 {dimension_numbers = #tpu.dot_dimension_numbers<[1], [0], [0], [1], [0, 0, 1, 1], [], []>} : vector<8x32xbf16>, vector<32x128xbf16>, vector<8x128xf32> -> vector<8x128xf32>
    %c0_59 = arith.constant 0 : index
    %c0_60 = arith.constant 0 : index
    %c0_61 = arith.constant 0 : index
    %160 = vector.load %arg14[%c0_59, %c0_60, %c0_61] : memref<1x1x128xf32, #tpu.memory_space<vmem>>, vector<1x1x128xf32>
    %161 = vector.shape_cast %160 : vector<1x1x128xf32> to vector<1x128xf32>
    %162 = vector.broadcast %161 : vector<1x128xf32> to vector<8x128xf32>
    %163 = arith.addf %159, %162 : vector<8x128xf32>
    %cst_62 = arith.constant 1.702000e+00 : f32
    %164 = vector.broadcast %cst_62 : f32 to vector<8x128xf32>
    %165 = arith.mulf %164, %163 : vector<8x128xf32>
    %166 = arith.negf %165 : vector<8x128xf32>
    %167 = math.exp %166 : vector<8x128xf32>
    %cst_63 = arith.constant 1.000000e+00 : f32
    %168 = vector.broadcast %cst_63 : f32 to vector<8x128xf32>
    %169 = arith.addf %168, %167 : vector<8x128xf32>
    %170 = arith.divf %168, %169 : vector<8x128xf32>
    %171 = arith.mulf %163, %170 : vector<8x128xf32>
    %c0_64 = arith.constant 0 : index
    %c0_65 = arith.constant 0 : index
    %c0_66 = arith.constant 0 : index
    %172 = vector.load %arg15[%c0_64, %c0_65, %c0_66] : memref<1x128x32xbf16, #tpu.memory_space<vmem>>, vector<1x128x32xbf16>
    %173 = vector.shape_cast %172 : vector<1x128x32xbf16> to vector<128x32xbf16>
    %174 = arith.truncf %171 : vector<8x128xf32> to vector<8x128xbf16>
    %cst_67 = arith.constant dense<0.000000e+00> : vector<8x32xf32>
    %175 = tpu.matmul %174, %173, %cst_67 {dimension_numbers = #tpu.dot_dimension_numbers<[1], [0], [0], [1], [0, 0, 1, 1], [], []>} : vector<8x128xbf16>, vector<128x32xbf16>, vector<8x32xf32> -> vector<8x32xf32>
    %176 = arith.addf %131, %175 : vector<8x32xf32>
    %c0_68 = arith.constant 0 : index
    %c0_69 = arith.constant 0 : index
    %c0_70 = arith.constant 0 : index
    %177 = vector.load %arg16[%c0_68, %c0_69, %c0_70] : memref<1x1x32xf32, #tpu.memory_space<vmem>>, vector<1x1x32xf32>
    %178 = vector.shape_cast %177 : vector<1x1x32xf32> to vector<1x32xf32>
    %179 = vector.broadcast %178 : vector<1x32xf32> to vector<8x32xf32>
    %180 = arith.addf %176, %179 : vector<8x32xf32>
    %c0_71 = arith.constant 0 : index
    %c0_72 = arith.constant 0 : index
    %181 = vector.load %arg21[%c0_71, %c0_72] : memref<8x32xf32, #tpu.memory_space<vmem>>, vector<8x32xf32>
    tpu.vector_store %arg21[%c0_71, %c0_72], %180 {strides = array<i32>} : memref<8x32xf32, #tpu.memory_space<vmem>>, vector<8x32xf32>,
    %c1_i32 = arith.constant 1 : i32
    %182 = arith.cmpi eq, %arg1, %c1_i32 : i32
    %183 = arith.extui %182 : i1 to i32
    %c0_i32_73 = arith.constant 0 : i32
    %184 = arith.cmpi ne, %183, %c0_i32_73 : i32
    scf.if %184 {
      %185 = tpu.iota {dimensions = array<i32: 1>} : vector<1x8xi32>
      %186 = arith.index_cast %arg0 : i32 to index
      %187 = memref.load %arg2[%186] : memref<2xi32, #tpu.memory_space<smem>>
      %188 = vector.broadcast %187 : i32 to vector<1x8xi32>
      %189 = arith.cmpi eq, %185, %188 : vector<1x8xi32>
      %190 = arith.extui %189 : vector<1x8xi1> to vector<1x8xi32>
      %191 = arith.sitofp %190 : vector<1x8xi32> to vector<1x8xf32>
      %cst_74 = arith.constant dense<0.000000e+00> : vector<1x32xf32>
      %192 = tpu.matmul %191, %180, %cst_74 {dimension_numbers = #tpu.dot_dimension_numbers<[1], [0], [0], [1], [0, 0, 1, 1], [], []>} : vector<1x8xf32>, vector<8x32xf32>, vector<1x32xf32> -> vector<1x32xf32>
      %c0_75 = arith.constant 0 : index
      %c0_76 = arith.constant 0 : index
      %193 = vector.load %arg17[%c0_75, %c0_76] : memref<1x32xf32, #tpu.memory_space<vmem>>, vector<1x32xf32>
      %c0_77 = arith.constant 0 : index
      %c0_78 = arith.constant 0 : index
      %194 = vector.load %arg18[%c0_77, %c0_78] : memref<1x32xf32, #tpu.memory_space<vmem>>, vector<1x32xf32>
      %cst_79 = arith.constant dense<0.000000e+00> : vector<1xf32>
      %195 = vector.multi_reduction <add>, %192, %cst_79 [1] : vector<1x32xf32> to vector<1xf32>
      %196 = vector.shape_cast %195 : vector<1xf32> to vector<1x1xf32>
      %cst_80 = arith.constant 3.200000e+01 : f32
      %197 = vector.broadcast %cst_80 : f32 to vector<1x1xf32>
      %198 = arith.divf %196, %197 : vector<1x1xf32>
      %199 = vector.broadcast %198 : vector<1x1xf32> to vector<1x32xf32>
      %200 = arith.subf %192, %199 : vector<1x32xf32>
      %201 = arith.mulf %200, %200 : vector<1x32xf32>
      %cst_81 = arith.constant dense<0.000000e+00> : vector<1xf32>
      %202 = vector.multi_reduction <add>, %201, %cst_81 [1] : vector<1x32xf32> to vector<1xf32>
      %203 = vector.shape_cast %202 : vector<1xf32> to vector<1x1xf32>
      %cst_82 = arith.constant 3.200000e+01 : f32
      %204 = vector.broadcast %cst_82 : f32 to vector<1x1xf32>
      %205 = arith.divf %203, %204 : vector<1x1xf32>
      %cst_83 = arith.constant 9.99999974E-6 : f32
      %206 = vector.broadcast %cst_83 : f32 to vector<1x1xf32>
      %207 = arith.addf %205, %206 : vector<1x1xf32>
      %208 = math.rsqrt %207 : vector<1x1xf32>
      %209 = vector.broadcast %208 : vector<1x1xf32> to vector<1x32xf32>
      %210 = arith.mulf %200, %209 : vector<1x32xf32>
      %211 = arith.mulf %210, %193 : vector<1x32xf32>
      %212 = arith.addf %211, %194 : vector<1x32xf32>
      %c0_84 = arith.constant 0 : index
      %c0_85 = arith.constant 0 : index
      %213 = vector.load %arg19[%c0_84, %c0_85] : memref<32x128xbf16, #tpu.memory_space<vmem>>, vector<32x128xbf16>
      %214 = arith.truncf %212 : vector<1x32xf32> to vector<1x32xbf16>
      %cst_86 = arith.constant dense<0.000000e+00> : vector<1x128xf32>
      %215 = tpu.matmul %214, %213, %cst_86 {dimension_numbers = #tpu.dot_dimension_numbers<[1], [0], [0], [1], [0, 0, 1, 1], [], []>} : vector<1x32xbf16>, vector<32x128xbf16>, vector<1x128xf32> -> vector<1x128xf32>
      %216 = vector.shape_cast %215 : vector<1x128xf32> to vector<1x128xf32>
      %217 = vector.broadcast %216 : vector<1x128xf32> to vector<8x128xf32>
      %c0_87 = arith.constant 0 : index
      %c0_88 = arith.constant 0 : index
      %c0_89 = arith.constant 0 : index
      %218 = vector.load %arg20[%c0_87, %c0_88, %c0_89] : memref<1x8x128xf32, #tpu.memory_space<vmem>>, vector<1x8x128xf32>
      %219 = vector.shape_cast %218 : vector<1x8x128xf32> to vector<8x128xf32>
      %220 = vector.shape_cast %217 : vector<8x128xf32> to vector<1x8x128xf32>
      tpu.vector_store %arg20[%c0_87, %c0_88, %c0_89], %220 {strides = array<i32>} : memref<1x8x128xf32, #tpu.memory_space<vmem>>, vector<1x8x128xf32>,
    } else {
    }
    return
  }
  func.func @transform_0(%arg0: i32, %arg1: i32, %arg2: memref<2xi32, #tpu.memory_space<smem>>) -> (i32, i32, i32) {
    %c0_i32 = arith.constant 0 : i32
    %c0_i32_0 = arith.constant 0 : i32
    %c0_i32_1 = arith.constant 0 : i32
    return %arg0, %c0_i32, %c0_i32_0 : i32, i32, i32
  }
  func.func @transform_1(%arg0: i32, %arg1: i32, %arg2: memref<2xi32, #tpu.memory_space<smem>>) -> (i32, i32) {
    %c0_i32 = arith.constant 0 : i32
    %c0_i32_0 = arith.constant 0 : i32
    %c0_i32_1 = arith.constant 0 : i32
    return %c0_i32, %c0_i32_0 : i32, i32
  }
  func.func @transform_2(%arg0: i32, %arg1: i32, %arg2: memref<2xi32, #tpu.memory_space<smem>>) -> (i32, i32, i32) {
    %c0_i32 = arith.constant 0 : i32
    %c0_i32_0 = arith.constant 0 : i32
    %c0_i32_1 = arith.constant 0 : i32
    return %arg1, %c0_i32, %c0_i32_0 : i32, i32, i32
  }
  func.func @transform_3(%arg0: i32, %arg1: i32, %arg2: memref<2xi32, #tpu.memory_space<smem>>) -> (i32, i32, i32) {
    %c0_i32 = arith.constant 0 : i32
    %c0_i32_0 = arith.constant 0 : i32
    %c0_i32_1 = arith.constant 0 : i32
    return %arg1, %c0_i32, %c0_i32_0 : i32, i32, i32
  }
  func.func @transform_4(%arg0: i32, %arg1: i32, %arg2: memref<2xi32, #tpu.memory_space<smem>>) -> (i32, i32, i32) {
    %c0_i32 = arith.constant 0 : i32
    %c0_i32_0 = arith.constant 0 : i32
    %c0_i32_1 = arith.constant 0 : i32
    return %arg1, %c0_i32, %c0_i32_0 : i32, i32, i32
  }
  func.func @transform_5(%arg0: i32, %arg1: i32, %arg2: memref<2xi32, #tpu.memory_space<smem>>) -> (i32, i32, i32) {
    %c0_i32 = arith.constant 0 : i32
    %c0_i32_0 = arith.constant 0 : i32
    %c0_i32_1 = arith.constant 0 : i32
    return %arg1, %c0_i32, %c0_i32_0 : i32, i32, i32
  }
  func.func @transform_6(%arg0: i32, %arg1: i32, %arg2: memref<2xi32, #tpu.memory_space<smem>>) -> (i32, i32, i32) {
    %c0_i32 = arith.constant 0 : i32
    %c0_i32_0 = arith.constant 0 : i32
    %c0_i32_1 = arith.constant 0 : i32
    return %arg1, %c0_i32, %c0_i32_0 : i32, i32, i32
  }
  func.func @transform_7(%arg0: i32, %arg1: i32, %arg2: memref<2xi32, #tpu.memory_space<smem>>) -> (i32, i32, i32) {
    %c0_i32 = arith.constant 0 : i32
    %c0_i32_0 = arith.constant 0 : i32
    %c0_i32_1 = arith.constant 0 : i32
    return %arg1, %c0_i32, %c0_i32_0 : i32, i32, i32
  }
  func.func @transform_8(%arg0: i32, %arg1: i32, %arg2: memref<2xi32, #tpu.memory_space<smem>>) -> (i32, i32, i32) {
    %c0_i32 = arith.constant 0 : i32
    %c0_i32_0 = arith.constant 0 : i32
    %c0_i32_1 = arith.constant 0 : i32
    return %arg1, %c0_i32, %c0_i32_0 : i32, i32, i32
  }
  func.func @transform_9(%arg0: i32, %arg1: i32, %arg2: memref<2xi32, #tpu.memory_space<smem>>) -> (i32, i32, i32) {
    %c0_i32 = arith.constant 0 : i32
    %c0_i32_0 = arith.constant 0 : i32
    %c0_i32_1 = arith.constant 0 : i32
    return %arg1, %c0_i32, %c0_i32_0 : i32, i32, i32
  }
  func.func @transform_10(%arg0: i32, %arg1: i32, %arg2: memref<2xi32, #tpu.memory_space<smem>>) -> (i32, i32, i32) {
    %c0_i32 = arith.constant 0 : i32
    %c0_i32_0 = arith.constant 0 : i32
    %c0_i32_1 = arith.constant 0 : i32
    return %arg1, %c0_i32, %c0_i32_0 : i32, i32, i32
  }
  func.func @transform_11(%arg0: i32, %arg1: i32, %arg2: memref<2xi32, #tpu.memory_space<smem>>) -> (i32, i32, i32) {
    %c0_i32 = arith.constant 0 : i32
    %c0_i32_0 = arith.constant 0 : i32
    %c0_i32_1 = arith.constant 0 : i32
    return %arg1, %c0_i32, %c0_i32_0 : i32, i32, i32
  }
  func.func @transform_12(%arg0: i32, %arg1: i32, %arg2: memref<2xi32, #tpu.memory_space<smem>>) -> (i32, i32, i32) {
    %c0_i32 = arith.constant 0 : i32
    %c0_i32_0 = arith.constant 0 : i32
    %c0_i32_1 = arith.constant 0 : i32
    return %arg1, %c0_i32, %c0_i32_0 : i32, i32, i32
  }
  func.func @transform_13(%arg0: i32, %arg1: i32, %arg2: memref<2xi32, #tpu.memory_space<smem>>) -> (i32, i32, i32) {
    %c0_i32 = arith.constant 0 : i32
    %c0_i32_0 = arith.constant 0 : i32
    %c0_i32_1 = arith.constant 0 : i32
    return %arg1, %c0_i32, %c0_i32_0 : i32, i32, i32
  }
  func.func @transform_14(%arg0: i32, %arg1: i32, %arg2: memref<2xi32, #tpu.memory_space<smem>>) -> (i32, i32) {
    %c0_i32 = arith.constant 0 : i32
    %c0_i32_0 = arith.constant 0 : i32
    %c0_i32_1 = arith.constant 0 : i32
    return %c0_i32, %c0_i32_0 : i32, i32
  }
  func.func @transform_15(%arg0: i32, %arg1: i32, %arg2: memref<2xi32, #tpu.memory_space<smem>>) -> (i32, i32) {
    %c0_i32 = arith.constant 0 : i32
    %c0_i32_0 = arith.constant 0 : i32
    %c0_i32_1 = arith.constant 0 : i32
    return %c0_i32, %c0_i32_0 : i32, i32
  }
  func.func @transform_16(%arg0: i32, %arg1: i32, %arg2: memref<2xi32, #tpu.memory_space<smem>>) -> (i32, i32) {
    %c0_i32 = arith.constant 0 : i32
    %c0_i32_0 = arith.constant 0 : i32
    %c0_i32_1 = arith.constant 0 : i32
    return %c0_i32, %c0_i32_0 : i32, i32
  }
  func.func @transform_17(%arg0: i32, %arg1: i32, %arg2: memref<2xi32, #tpu.memory_space<smem>>) -> (i32, i32, i32) {
    %c0_i32 = arith.constant 0 : i32
    %c0_i32_0 = arith.constant 0 : i32
    %c0_i32_1 = arith.constant 0 : i32
    return %arg0, %c0_i32, %c0_i32_0 : i32, i32, i32
  }
}

</mosaic_0001>

<bundles_post_ra>
// kernel: tpu_custom_call.1
= control target key start
LH: loop header
LB: loop body
LE: loop exit
PB: predicated region body
PF: predicated region fallthrough
CT: control target
= control target key end

     0   :  { %s2936_s0 = inlined_call_operand.vmem [shape: s32[2], index: 0, kind: input, shape index: {}]   ;;  %s2937_s1 = inlined_call_operand.vmem [shape: f32[2,8,32], index: 1, kind: input, shape index: {}]   ;;  %s2938_s2 = inlined_call_operand.vmem [shape: f32[8,32], index: 2, kind: input, shape index: {}]   ;;  %s2939_s3 = inlined_call_operand.vmem [shape: f32[2,1,32], index: 3, kind: input, shape index: {}]   ;;  %s2940_s4 = inlined_call_operand.vmem [shape: f32[2,1,32], index: 4, kind: input, shape index: {}]   ;;  %s2941_s5 = inlined_call_operand.vmem [shape: bf16[2,32,96], index: 5, kind: input, shape index: {}]   ;;  %s2942_s6 = inlined_call_operand.vmem [shape: f32[2,1,96], index: 6, kind: input, shape index: {}]   ;;  %s2943_s7 = inlined_call_operand.vmem [shape: bf16[2,32,32], index: 7, kind: input, shape index: {}]   ;;  %s2944_s8 = inlined_call_operand.vmem [shape: f32[2,1,32], index: 8, kind: input, shape index: {}]   ;;  %s2945_s9 = inlined_call_operand.vmem [shape: f32[2,1,32], index: 9, kind: input, shape index: {}]   ;;  %s2946_s10 = inlined_call_operand.vmem [shape: f32[2,1,32], index: 10, kind: input, shape index: {}]   ;;  %s2947_s11 = inlined_call_operand.vmem [shape: bf16[2,32,128], index: 11, kind: input, shape index: {}]   ;;  %s2948_s12 = inlined_call_operand.vmem [shape: f32[2,1,128], index: 12, kind: input, shape index: {}]   ;;  %s2949_s13 = inlined_call_operand.vmem [shape: bf16[2,128,32], index: 13, kind: input, shape index: {}]   ;;  %s2950_s14 = inlined_call_operand.vmem [shape: f32[2,1,32], index: 14, kind: input, shape index: {}]   ;;  %s2951_s15 = inlined_call_operand.vmem [shape: f32[1,32], index: 15, kind: input, shape index: {}]   ;;  %s2952_s16 = inlined_call_operand.vmem [shape: f32[1,32], index: 16, kind: input, shape index: {}]   ;;  %s2953_s17 = inlined_call_operand.vmem [shape: bf16[32,128], index: 17, kind: input, shape index: {}]   ;;  %s2954_s18 = inlined_call_operand.hbm [shape: f32[2,8,128], index: 18, kind: output, shape index: {}]  }
   0x1   :  { %2971 = sst [smem:[#allocation22_spill]] %s2936_s0 }
   0x2   :  { %2972 = sst [smem:[#allocation23_spill]] %s2937_s1  ;;  %s2982_s29 = sld [smem:[#allocation22_spill]] }
   0x3   :  { %2973 = sst [smem:[#allocation24_spill]] %s2938_s2 }
   0x4   :  { %2974 = sst [smem:[#allocation25_spill]] %s2940_s4 }
   0x5   :  { %2975 = sst [smem:[#allocation26_spill]] %s2941_s5 }
   0x6   :  { %2976 = sst [smem:[#allocation27_spill]] %s2943_s7 }
   0x7   :  { %2977 = sst [smem:[#allocation28_spill]] %s2948_s12 }
   0x8   :  { %2978 = sst [smem:[#allocation29_spill]] %s2951_s15  ;;  %s23_s12 = sshll.u32 %s2982_s29, 4  ;;  %s24_s12 = int_to_ptr.vmem [resolvable:$true] %s23_s12 }
   0x9   :  { %2979 = sst [smem:[#allocation30_spill]] %s2952_s16  ;;  %s2327_s30 = scalar_lea.vmem %s24_s12, 16 }
   0xa   :  { %2980 = sst [smem:[#allocation31_spill]] %s2953_s17  ;;  %p2328_p0 = scmp.ne.s32.totalorder %s24_s12, %s2327_s30 }
   0xb   :  { %2981 = sst [smem:[#allocation32_spill]] %s2954_s18  ;;  %p2332_p1 = scmp.lt.s32.totalorder %s24_s12, %s24_s12 }
   0xc   :  { %p2333_p2 = scmp.lt.s32.totalorder %s2327_s30, %s2327_s30 }
   0xe   :  { %p2334_p3 = por %p2333_p2, %p2332_p1 }
  0x10   :  { %p2335_p4 = pnand %p2334_p3, %p2328_p0 }
  0x12   :  { %2338 = shalt.err (!%p2335_p4)  }
  0x13   :  { %s2437_s0 = smov [#allocation4]  }
  0x14   :  { %26 = dma.vmem_to_smem %s24_s12, 16, %s2437_s0, [#allocation3] }
  0x15   :  { %2399 = dma.done.wait [#allocation3], 16 }
  0x16   :  { %2400 = vsyncadd [#allocation3], 4294967280 }
  0x17   :  { %28 = sfence }
  0x18   :  { %29 = vsyncpa [#allocation6], 0 }
  0x19   :  { %31 = vsyncpa [#allocation6 + $0x1], 0  ;;  %s2556_s19 = smov 0   ;;  %s2558_s1 = smov 0  }
  0x1a   :  { %s2560_s20 = smov 0   ;;  %s2562_s21 = smov 0  }
  0x1b   :  { %s2564_s22 = smov 0   ;;  %s2566_s2 = smov 0  }
  0x1c   :  { %s2568_s23 = smov 0   ;;  %s2570_s12 = smov 0  }
  0x1d LB: > { %2983 = sst [smem:[#allocation9_spill]] %s2407_s19  ;;  %s1986_s24 = sadd.s32 4294967295, %s2435_s12   ;;  %s2435_s12 = sphi %s2570_s12, %s37_s12   ;;  %s2431_s23 = sphi %s2568_s23, %s3031_s23   ;;  %s2427_s2 = sphi %s2566_s2, %s3030_s2   ;;  %s2423_s22 = sphi %s2564_s22, %s3029_s22   ;;  %s2419_s21 = sphi %s2562_s21, %s3028_s21   ;;  %s2415_s20 = sphi %s2560_s20, %s3027_s20   ;;  %s2411_s1 = sphi %s2558_s1, %s3026_s1   ;;  %s2407_s19 = sphi %s2556_s19, %s3025_s19  }
  0x1e   : > { %2984 = sst [smem:[#allocation10_spill]] %s2411_s1  ;;  %s1987_s25 = sadd.s32 4294967294, %s2435_s12  }
  0x1f   : > { %2985 = sst [smem:[#allocation11_spill]] %s2415_s20  ;;  %s46_s26 = sadd.s32 1, %s2427_s2 }
  0x20   : > { %2986 = sst [smem:[#allocation12_spill]] %s2423_s22  ;;  %p47_p5 = scmp.ge.s32.totalorder %s46_s26, 2 }
  0x21   : > { %2987 = sst [smem:[#allocation13_spill]] %s2427_s2  ;;  %s49_s27 = sadd.s32 1, %s2431_s23 }
  0x22   : > { %2988 = sst [smem:[#allocation14_spill]] %s2431_s23  ;;  %p488_p6 = scmp.ne.s32.totalorder %s2415_s20, %s2411_s1 }
  0x23   : > { %2989 = sst [smem:[#allocation15_spill]] %s2435_s12  ;;  %p489_p7 = scmp.eq.s32.totalorder %s1986_s24, 3 }
  0x24   : > { %s3033_s26 = smov (%p47_p5, %s46_s26), 0  ;;  %s3035_s27 = smov (!%p47_p5, %s49_s27), %s2431_s23 }
  0x25   : > { %2990 = sst [smem:[#allocation16_spill]] %s3033_s26  ;;  %p2605_p8 = por %p489_p7, %p488_p6 }
  0x26   : > { %p494_p9 = scmp.ne.s32.totalorder %s2411_s1, %s2407_s19  ;;  %p51_p10 = scmp.ge.s32.totalorder %s3035_s27, 2 }
  0x27   : > { %s2991_s28 = scalar_select %p2605_p8, 1, 0 }
  0x28   : > { %p495_p11 = scmp.eq.s32.totalorder %s1987_s25, 3  ;;  %p1990_p12 = scmp.ge.s32.totalorder %s2435_s12, 1 }
  0x29   : > { %2992 = sst [smem:[#allocation17_spill]] %s2991_s28  ;;  %p612_p13 = scmp.lt.s32.totalorder %s2435_s12, 5 }
  0x2a   : > { %s3037_s27 = smov (%p51_p10, %s3035_s27), 0  ;;  %p2615_p0 = por %p495_p11, %p494_p9 }
  0x2b   : > { %2993 = sst [smem:[#allocation18_spill]] %s3037_s27  ;;  %p613_p1 = pnand %p1990_p12, %p612_p13 }
  0x2c   : > { %s2994_s29 = scalar_select %p2615_p0, 1, 0 }
  0x2d   : > { %s475_s30 = ssub.s32 %s2431_s23, %s3037_s27  ;;  %s478_s0 = sadd.s32 1, %s2415_s20 }
  0x2e   : > { %2995 = sst [smem:[#allocation19_spill]] %s2994_s29  ;;  %p476_p2 = scmp.eq.s32.totalorder %s475_s30, 0 }
  0x2f   : > { %616 = sbr.rel (%p613_p1) target bundleno = 3417 (0xd59), region = 88 }
  0x30   : > { %s2623_s24 = scalar_select %p476_p2, %s2415_s20, %s478_s0  }
  0x32   : > { %2996 = sst [smem:[#allocation20_spill]] %s2623_s24 }
  0x36   : > { %s2959_s25 = sand.u32 1, %s2411_s1   ;;  %p707_p3 = scmp.lt.s32.totalorder %s2423_s22, 1 }
  0x37   : > { %s2629_s26 = sshll.u32 %s2959_s25, 3  ;;  %p711_p4 = scmp.lt.s32.totalorder %s2419_s21, 1 }
  0x38   : > { %s708_s2 = scalar_select %p707_p3, %s2423_s22, 1 }
  0x39   : > { %s2634_s29 = scalar_select %p711_p4, %s2419_s21, 1 }
  0x3a   : > { %s1992_s30 = sshll.u32 %s708_s2, 3  ;;  %s2997_s23 = sld [smem:[#allocation23_spill]] }
  0x3b   : > { %s2046_s1 = sshll.u32 %s2634_s29, 4  ;;  %s2999_s5 = sld [smem:[#allocation26_spill]] }
  0x3c   : > { %s3000_s7 = sld [smem:[#allocation27_spill]]  ;;  %s2677_s2 = scalar_lea.vmem %s2947_s11, %s2046_s1 }
  0x3d   : > { %s3002_s27 = sld [smem:[#allocation28_spill]]  ;;  %s754_s18 = scalar_lea.vmem %s2950_s14, %s2634_s29 }
  0x3e   : > { %s706_s15 = scalar_lea.vmem [#allocation5], %s2629_s26  ;;  %p2001_p5 = scmp.ne.s32.totalorder %s2419_s21, 0 }
  0x3f   : > { %s3003_s16 = sld [smem:[#allocation24_spill]] (!%p2001_p5)  ;;  %vm763_vm0 = vcmask (!%p2001_p5), 261120  }
  0x40   : > { %s710_s25 = scalar_lea.vmem %s2997_s23, %s1992_s30  ;;  %759 = sbr.rel (%p2001_p5) target bundleno = 73 (0x49), region = 92 }
  0x41   : > { %s2651_s17 = scalar_lea.vmem %s2999_s5, %s2046_s1  ;;  %s738_s5 = scalar_lea.vmem %s2946_s10, %s2634_s29  ;;  %v760_v0 = vld [vmem:[%s710_s25] sm:$0xff] (!%p2001_p5) }
  0x42   : > { %s2660_s30 = scalar_lea.vmem %s3000_s7, %s2046_s1 }
  0x43   : > { %3001 = sst [smem:[#allocation21_spill]] %s2660_s30  ;;  %s746_s7 = scalar_lea.vmem %s3002_s27, %s2634_s29 }
  0x44   : > { %s2049_s30 = sshll.u32 %s2634_s29, 6 }
  0x45   : > { %s2691_s19 = scalar_lea.vmem %s2949_s13, %s2049_s30  ;;  %v761_v1 = vld [vmem:[%s3003_s16] sm:$0xff] (!%p2001_p5) }
  0x46   : > { %v762_v2 = vadd.f32 (!%p2001_p5), %v761_v1, %v760_v0 }
  0x48   : > { %764 = vst.msk [vmem:[#allocation2] sm:$0xff] %vm763_vm0, %v762_v2 }
  0x49 PF: > { %vm774_vm1 = vcmask 261120   ;;  %v2285_v10 = vld [vmem:[%s2651_s17] sm:$0xff]   ;;  %v2438_v11 = vmov 0.0   ;;  %vm2439_vm2 = vmmov 0   ;;  %v2286_v12 = vld [vmem:[%s2651_s17 + $0x8] sm:$0xff]   ;;  %s3004_s17 = scalar_lea.vmem %s2939_s3, %s2634_s29  ;;  %s3005_s0 = sld [smem:[#allocation25_spill]]  ;;  %v766_v41 = vlaneseq }
  0x4a   : > { %2089 = vmatprep.subr.bf16.mxu0 %v2438_v11  ;;  %2093 = vmatprep.mubr.msk.bf16.mxu0 %vm2439_vm2, %v2438_v11  ;;  %v2002_v17 = vld [vmem:[%s3004_s17] ss:$0 sm:$0xff]  ;;  %s3007_s28 = scalar_lea.vmem %s2942_s6, %s2634_s29  ;;  %s2440_s12 = smov 120   ;;  %vm874_vm3 = vcmask 64512   ;;  %v2447_v44 = vmov -1e+09  }
  0x4b   : > { %2090 = vmatpush3.bf16.msra.mxu0 %v2285_v10  ;;  %2109 = vmatprep.subr.bf16.mxu1 %v2438_v11  ;;  %v2004_v23 = vld [vmem:[%s3007_s28] ss:$0 sm:$0xff]  ;;  %s2441_s4 = smov 96   ;;  %s2442_s1 = smov 88   ;;  %v2762_v42 = vshrl.u32 %v766_v41, 7  ;;  %v2764_v43 = vand.u32 127, %v766_v41 }
  0x4c   : > { %2091 = vmatprep.subr.bf16.mxu0 %v2438_v11  ;;  %2111 = vmatprep.mubr.msk.bf16.mxu1 %vm2439_vm2, %v2438_v11  ;;  %s2443_s16 = smov 80   ;;  %s2444_s25 = smov 112   ;;  %vm938_vm5 = vcmask 1043456   ;;  %vm1325_vm6 = vcmask 130048   ;;  %vm1327_vm7 = vcmask 195584  }
  0x4d   : > { %s2445_s27 = smov 72   ;;  %s2446_s17 = smov 104   ;;  %vm770_vm4 = vcmp.le.s32.totalorder %v2764_v43, %v2762_v42 }
  0x4e   : > { %v771_v45 = vsel %vm770_vm4, 0.0, %v2447_v44  ;;  %s2448_s30 = smov 64   ;;  %s2449_s22 = smov 56  }
  0x4f   : > { %v2698_v3 = vld [vmem:[#allocation2] sm:$0xff]  ;;  %2092 = vmatpush3.bf16.msra.mxu0 %v2286_v12  ;;  %s3006_s23 = scalar_lea.vmem %s3005_s0, %s2634_s29  ;;  %s2450_s0 = smov 48  }
  0x50   : > { %v775_v4 = vsel %vm774_vm1, %v2698_v3, 0.0  ;;  %2097 = vmatprep.subr.bf16.mxu0 %v2438_v11  ;;  %v2003_v19 = vld [vmem:[%s3006_s23] ss:$0 sm:$0xff]  ;;  %s2451_s23 = smov 40   ;;  %s3008_s20 = sld [smem:[#allocation21_spill]] }
  0x51   : > { %776 = vadd.xlane.f32.xlu0 %v775_v4  ;;  %s2452_s24 = smov 8   ;;  %s2453_s28 = smov 16  }
  0x52   : > { %p2036_p6 = scmp.ne.s32.totalorder %s2419_s21, 1 }
  0x53   : > { %vm2456_vm8 = vmmov (!%p2036_p6), 0   ;;  %vm1701_vm10 = vcmask (!%p2036_p6), 253952  }
  0xde   : > { %v777_v5 = vpop.xlane.xlu0 %776 }
  0xdf   : > { %v779_v6 = vmul.f32 0.03125, %v777_v5 }
  0xe1   : > { %v780_v7 = vsub.f32 %v2698_v3, %v779_v6 }
  0xe3   : > { %v781_v8 = vmul.f32 %v780_v7, %v780_v7 }
  0xe5   : > { %v782_v9 = vsel %vm774_vm1, %v781_v8, 0.0 }
  0xe6   : > { %783 = vadd.xlane.f32.xlu0 %v782_v9 }
 0x173   : > { %v784_v13 = vpop.xlane.xlu0 %783 }
 0x174   : > { %v785_v14 = vmul.f32 0.03125, %v784_v13 }
 0x176   : > { %v786_v15 = vadd.f32 1e-05, %v785_v14 }
 0x178   : > { %2299 = vrsqrt.f32 %v786_v15 }
 0x182   : > { %v2300_v16 = vpop.eup %2299 }
 0x183   : > { %v788_v18 = vmul.f32 %v2300_v16, %v780_v7 }
 0x185   : > { %v795_v20 = vmul.f32 %v2002_v17, %v788_v18 }
 0x187   : > { %v802_v21 = vadd.f32 %v2003_v19, %v795_v20 }
 0x189   : > { %v807_v22 = vpack.c.bf16 %v802_v21, %v802_v21 }
 0x18b   : > { %2094 = vmatmul.mubr.msk.bf16.vlgmr.msra.gmra.mrb[0].mxu0 %vm774_vm1, %v807_v22 }
 0x18c   : > { %2099 = vmatprep.mubr.msk.bf16.mxu0 %vm2439_vm2, %v2438_v11 }
 0x25e   : > { %v864_v24 = vpop.f32.mrb[0].mxu0 }
 0x25f   : > { %v865_v25 = vadd.f32 %v2004_v23, %v864_v24  ;;  %v2095_v26 = vpop.f32.mrb[1].mxu0 }
 0x260   : > { %v867_v27 = vpop.f32.mrb[2].mxu0 }
 0x261   : > { %v2732_v28 = vpack.c.bf16 %v865_v25, %v865_v25  ;;  %v2096_v29 = vpop.f32.mrb[3].mxu0 }
 0x263   : > { %982 = vrot.lane.b32.xlu0 %v2732_v28, %s2440_s12  ;;  %872 = vrot.lane.b32.xlu1 %v2732_v28, %s2441_s4  ;;  %s2454_s12 = smov 24  }
 0x267   : > { %984 = vrot.lane.b32.xlu1 %v2732_v28, %s2442_s1  ;;  %s3014_s1 = sld [smem:[#allocation29_spill]] (!%p2036_p6) }
 0x26b   : > { %1094 = vrot.lane.b32.xlu1 %v2732_v28, %s2443_s16  ;;  %s3009_s16 = scalar_lea.vmem %s2944_s8, %s2634_s29 }
 0x26f   : > { %1092 = vrot.lane.b32.xlu1 %v2732_v28, %s2444_s25 }
 0x273   : > { %1204 = vrot.lane.b32.xlu1 %v2732_v28, %s2445_s27  ;;  %s3015_s27 = sld [smem:[#allocation30_spill]] (!%p2036_p6) }
 0x277   : > { %1202 = vrot.lane.b32.xlu1 %v2732_v28, %s2446_s17  ;;  %s3010_s17 = scalar_lea.vmem %s2945_s9, %s2634_s29 }
 0x2d5   : > { %v873_v30 = vpop.permute.xlu1 %872  ;;  %v983_v35 = vpop.permute.xlu0 %982 }
 0x2d6   : > { %v879_v31 = vsel %vm874_vm3, %v873_v30, 0 }
 0x2d7   : > { %2098 = vmatpush3.bf16.xpose.msra.mxu0 %v879_v31 }
 0x2d8   : > { %2103 = vmatprep.subr.bf16.mxu0 %v2438_v11 }
 0x2d9   : > { %v985_v32 = vpop.permute.xlu1 %984 }
 0x2da   : > { %v990_v33 = vsel %vm874_vm3, %v985_v32, 0 }
 0x2db   : > { %2110 = vmatpush3.bf16.xpose.msra.mxu1 %v990_v33 }
 0x2dc   : > { %2121 = vmatprep.subr.bf16.mxu1 %v2438_v11 }
 0x2dd   : > { %v1095_v34 = vpop.permute.xlu1 %1094 }
 0x2de   : > { %2100 = vmatmul.mubr.msk.bf16.vlgmr.msra.gmra.mrb[4].mxu0 %vm874_vm3, %v2732_v28  ;;  %v1100_v37 = vsel %vm874_vm3, %v1095_v34, 0 }
 0x2df   : > { %2105 = vmatprep.mubr.msk.bf16.mxu0 %vm2439_vm2, %v2438_v11 }
 0x2e1   : > { %v1093_v36 = vpop.permute.xlu1 %1092 }
 0x2e2   : > { %2112 = vmatmul.mubr.msk.bf16.vlgmr.msra.gmra.mrb[0].mxu1 %vm874_vm3, %v983_v35 }
 0x2e3   : > { %2122 = vmatpush3.bf16.xpose.msra.mxu1 %v1100_v37  ;;  %2123 = vmatprep.mubr.msk.bf16.mxu1 %vm2439_vm2, %v2438_v11 }
 0x2e4   : > { %2133 = vmatprep.subr.bf16.mxu1 %v2438_v11 }
 0x2e5   : > { %v1205_v38 = vpop.permute.xlu1 %1204 }
 0x2e6   : > { %v1210_v39 = vsel %vm874_vm3, %v1205_v38, 0 }
 0x2e9   : > { %v1203_v40 = vpop.permute.xlu1 %1202 }
 0x2ea   : > { %2124 = vmatmul.mubr.msk.bf16.vlgmr.msra.gmra.mrb[4].mxu1 %vm874_vm3, %v1093_v36 }
 0x2eb   : > { %2134 = vmatpush3.bf16.xpose.msra.mxu1 %v1210_v39  ;;  %2135 = vmatprep.mubr.msk.bf16.mxu1 %vm2439_vm2, %v2438_v11 }
 0x2ec   : > { %2145 = vmatprep.subr.bf16.mxu1 %v2438_v11 }
 0x2f2   : > { %2136 = vmatmul.mubr.msk.bf16.vlgmr.msra.gmra.mrb[8].mxu1 %vm874_vm3, %v1203_v40 }
 0x2f3   : > { %2149 = vmatprep.mubr.msk.bf16.mxu1 %vm2439_vm2, %v2438_v11 }
 0x3b1   : > { %v915_v46 = vpop.f32.mrb[4].mxu0 }
 0x3b2   : > { %v916_v47 = vadd.f32 %v915_v46, %v771_v45  ;;  %v2101_v48 = vpop.f32.mrb[5].mxu0 }
 0x3b3   : > { %v918_v49 = vpop.f32.mrb[6].mxu0 }
 0x3b4   : > { %v2102_v50 = vpop.f32.mrb[7].mxu0  ;;  %v921_v51 = vsel %vm874_vm3, %v916_v47, -inf }
 0x3b5   : > { %v1026_v52 = vpop.f32.mrb[0].mxu1  ;;  %922 = vmax.xlane.f32.xlu1 %v921_v51 }
 0x3b6   : > { %v1027_v53 = vadd.f32 %v1026_v52, %v771_v45  ;;  %v2113_v54 = vpop.f32.mrb[1].mxu1 }
 0x3b7   : > { %v1029_v55 = vpop.f32.mrb[2].mxu1 }
 0x3b8   : > { %v2114_v56 = vpop.f32.mrb[3].mxu1  ;;  %v1032_v57 = vsel %vm874_vm3, %v1027_v53, -inf }
 0x3b9   : > { %1033 = vmax.xlane.f32.xlu0 %v1032_v57 }
 0x3bd   : > { %v1136_v58 = vpop.f32.mrb[4].mxu1 }
 0x3be   : > { %v1137_v59 = vadd.f32 %v1136_v58, %v771_v45  ;;  %v2125_v60 = vpop.f32.mrb[5].mxu1 }
 0x3bf   : > { %v1139_v61 = vpop.f32.mrb[6].mxu1 }
 0x3c0   : > { %v2126_v62 = vpop.f32.mrb[7].mxu1  ;;  %v1142_v63 = vsel %vm874_vm3, %v1137_v59, -inf }
 0x3c1   : > { %1143 = vmax.xlane.f32.xlu1 %v1142_v63  ;;  %v2287_v62 = vld [vmem:[%s3008_s20] sm:$0xff]   ;;  %v2288_v63 = vld [vmem:[%s3008_s20 + $0x8] sm:$0xff]  }
 0x3c2   : > { %2146 = vmatpush3.bf16.msra.mxu1 %v2287_v62 }
 0x3c3   : > { %2147 = vmatprep.subr.bf16.mxu1 %v2438_v11 }
 0x3c5   : > { %v1246_v0 = vpop.f32.mrb[8].mxu1 }
 0x3c6   : > { %v1247_v1 = vadd.f32 %v1246_v0, %v771_v45  ;;  %v2137_v2 = vpop.f32.mrb[9].mxu1  ;;  %2148 = vmatpush3.bf16.msra.mxu1 %v2288_v63 }
 0x3c7   : > { %v1249_v4 = vpop.f32.mrb[10].mxu1  ;;  %2161 = vmatprep.subr.bf16.mxu1 %v2438_v11 }
 0x3c8   : > { %v2138_v5 = vpop.f32.mrb[11].mxu1  ;;  %v1252_v6 = vsel %vm874_vm3, %v1247_v1, -inf }
 0x3c9   : > { %1253 = vmax.xlane.f32.xlu0 %v1252_v6 }
 0x442   : > { %v923_v7 = vpop.xlane.xlu1 %922 }
 0x443   : > { %v924_v8 = vsub.f32 %v916_v47, %v923_v7 }
 0x445   : > { %v925_v9 = vmul.f32 1.442695, %v924_v8 }
 0x446   : > { %v1034_v10 = vpop.xlane.xlu0 %1033 }
 0x447   : > { %2301 = vpow2.f32 %v925_v9  ;;  %v1035_v12 = vsub.f32 %v1027_v53, %v1034_v10 }
 0x449   : > { %v1036_v13 = vmul.f32 1.442695, %v1035_v12 }
 0x44b   : > { %2303 = vpow2.f32 %v1036_v13 }
 0x44e   : > { %v1144_v23 = vpop.xlane.xlu1 %1143 }
 0x44f   : > { %v1145_v24 = vsub.f32 %v1137_v59, %v1144_v23 }
 0x451   : > { %v2302_v14 = vpop.eup %2301  ;;  %v1146_v25 = vmul.f32 1.442695, %v1145_v24 }
 0x452   : > { %v927_v15 = vsel %vm874_vm3, %v2302_v14, 0.0 }
 0x453   : > { %928 = vadd.xlane.f32.xlu1 %v927_v15 }
 0x455   : > { %v2304_v16 = vpop.eup %2303 }
 0x456   : > { %v1254_v17 = vpop.xlane.xlu0 %1253  ;;  %v1038_v18 = vsel %vm874_vm3, %v2304_v16, 0.0 }
 0x457   : > { %v1255_v19 = vsub.f32 %v1247_v1, %v1254_v17  ;;  %1039 = vadd.xlane.f32.xlu0 %v1038_v18  ;;  %v2019_v18 = vld [vmem:[%s3009_s16] ss:$0 sm:$0xff] }
 0x459   : > { %v1256_v20 = vmul.f32 1.442695, %v1255_v19 }
 0x45b   : > { %2305 = vpow2.f32 %v1256_v20 }
 0x45c   : > { %2307 = vpow2.f32 %v1146_v25 }
 0x464   : > { %933 = vrot.lane.b32.xlu1 %v2732_v28, %s2448_s30 }
 0x465   : > { %v2306_v21 = vpop.eup %2305 }
 0x466   : > { %v1258_v22 = vsel %vm874_vm3, %v2306_v21, 0.0  ;;  %v2308_v26 = vpop.eup %2307 }
 0x467   : > { %1259 = vadd.xlane.f32.xlu0 %v1258_v22  ;;  %v1148_v27 = vsel %vm874_vm3, %v2308_v26, 0.0 }
 0x47d   : > { %1044 = vrot.lane.b32.xlu0 %v2732_v28, %s2449_s22 }
 0x488   : > { %1149 = vadd.xlane.f32.xlu1 %v1148_v27 }
 0x499   : > { %1154 = vrot.lane.b32.xlu1 %v2732_v28, %s2450_s0 }
 0x49d   : > { %1264 = vrot.lane.b32.xlu1 %v2732_v28, %s2451_s23 }
 0x4e0   : > { %v929_v29 = vpop.xlane.xlu1 %928 }
 0x4e1   : > { %2309 = vrcp.f32 %v929_v29 }
 0x4e4   : > { %v934_v30 = vpop.permute.xlu1 %933  ;;  %v1040_v32 = vpop.xlane.xlu0 %1039 }
 0x4e5   : > { %v940_v31 = vsel %vm938_vm5, %v934_v30, 0  ;;  %2311 = vrcp.f32 %v1040_v32 }
 0x4e6   : > { %2104 = vmatpush3.bf16.msra.mxu0 %v940_v31  ;;  %v2290_v31 = vld [vmem:[%s2677_s2 + $0x8] sm:$0xff]  }
 0x4e7   : > { %2115 = vmatprep.subr.bf16.mxu0 %v2438_v11 }
 0x4eb   : > { %v2310_v33 = vpop.eup %2309 }
 0x4ec   : > { %v931_v34 = vmul.f32 %v2310_v33, %v2302_v14 }
 0x4ee   : > { %v932_v35 = vpack.c.bf16 %v931_v34, %v931_v34 }
 0x4ef   : > { %v2312_v28 = vpop.eup %2311 }
 0x4f0   : > { %2106 = vmatmul.mubr.msk.bf16.vlgmr.msra.gmra.mrb[8].mxu0 %vm874_vm3, %v932_v35  ;;  %v1042_v37 = vmul.f32 %v2312_v28, %v2304_v16  ;;  %v2020_v28 = vld [vmem:[%s3010_s17] ss:$0 sm:$0xff] }
 0x4f1   : > { %2117 = vmatprep.mubr.msk.bf16.mxu0 %vm2439_vm2, %v2438_v11 }
 0x4f2   : > { %v1043_v40 = vpack.c.bf16 %v1042_v37, %v1042_v37  ;;  %v2021_v37 = vld [vmem:[%s738_s5] ss:$0 sm:$0xff] }
 0x4f4   : > { %v1260_v36 = vpop.xlane.xlu0 %1259 }
 0x4f8   : > { %v1045_v38 = vpop.permute.xlu0 %1044 }
 0x4f9   : > { %v1050_v39 = vsel %vm938_vm5, %v1045_v38, 0 }
 0x4fa   : > { %2116 = vmatpush3.bf16.msra.mxu0 %v1050_v39 }
 0x4fb   : > { %2127 = vmatprep.subr.bf16.mxu0 %v2438_v11 }
 0x4fd   : > { %2118 = vmatmul.mubr.msk.bf16.vlgmr.msra.gmra.mrb[12].mxu0 %vm874_vm3, %v1043_v40 }
 0x4fe   : > { %2129 = vmatprep.mubr.msk.bf16.mxu0 %vm2439_vm2, %v2438_v11 }
 0x515   : > { %v1150_v41 = vpop.xlane.xlu1 %1149 }
 0x516   : > { %2313 = vrcp.f32 %v1150_v41  ;;  %v2291_v41 = vld [vmem:[%s2691_s19] sm:$0xff]  }
 0x517   : > { %2315 = vrcp.f32 %v1260_v36 }
 0x519   : > { %v1155_v44 = vpop.permute.xlu1 %1154 }
 0x51a   : > { %v1160_v45 = vsel %vm938_vm5, %v1155_v44, 0  ;;  %v2292_v44 = vld [vmem:[%s2691_s19 + $0x8] sm:$0xff]  }
 0x51b   : > { %2128 = vmatpush3.bf16.msra.mxu0 %v1160_v45  ;;  %v2293_v45 = vld [vmem:[%s2691_s19 + $0x10] sm:$0xff]  }
 0x51c   : > { %2139 = vmatprep.subr.bf16.mxu0 %v2438_v11 }
 0x51d   : > { %v1265_v48 = vpop.permute.xlu1 %1264 }
 0x51e   : > { %v1270_v51 = vsel %vm938_vm5, %v1265_v48, 0  ;;  %v2296_v48 = vld [vmem:[%s2691_s19 + $0x28] sm:$0xff]  }
 0x520   : > { %v2314_v46 = vpop.eup %2313 }
 0x521   : > { %v1152_v47 = vmul.f32 %v2314_v46, %v2308_v26  ;;  %v2316_v50 = vpop.eup %2315  ;;  %v2294_v46 = vld [vmem:[%s2691_s19 + $0x18] sm:$0xff]  }
 0x522   : > { %v1262_v52 = vmul.f32 %v2316_v50, %v2306_v21  ;;  %v2298_v50 = vld [vmem:[%s2691_s19 + $0x38] sm:$0xff]  }
 0x523   : > { %v1153_v49 = vpack.c.bf16 %v1152_v47, %v1152_v47  ;;  %v2295_v47 = vld [vmem:[%s2691_s19 + $0x20] sm:$0xff]  }
 0x524   : > { %v1263_v53 = vpack.c.bf16 %v1262_v52, %v1262_v52 }
 0x525   : > { %2130 = vmatmul.mubr.msk.bf16.vlgmr.msra.gmra.mrb[16].mxu0 %vm874_vm3, %v1153_v49  ;;  %v2297_v49 = vld [vmem:[%s2691_s19 + $0x30] sm:$0xff]  }
 0x526   : > { %2140 = vmatpush3.bf16.msra.mxu0 %v1270_v51  ;;  %2141 = vmatprep.mubr.msk.bf16.mxu0 %vm2439_vm2, %v2438_v11  ;;  %v2022_v51 = vld [vmem:[%s746_s7] ss:$0 sm:$0xff]  ;;  %s3012_s7 = sld [smem:[#allocation12_spill]] (!%p2036_p6) }
 0x527   : > { %2153 = vmatprep.subr.bf16.mxu0 %v2438_v11 }
 0x52c   : > { %s1621_s20 = sld [smem:[#allocation4 + %s3012_s7]] (!%p2036_p6) }
 0x52d   : > { %2142 = vmatmul.mubr.msk.bf16.vlgmr.msra.gmra.mrb[20].mxu0 %vm874_vm3, %v1263_v53 }
 0x52e   : > { %2157 = vmatprep.mubr.msk.bf16.mxu0 %vm2439_vm2, %v2438_v11 }
 0x5c3   : > { %v976_v54 = vpop.f32.mrb[8].mxu0 }
 0x5c4   : > { %v2107_v55 = vpop.f32.mrb[9].mxu0 }
 0x5c5   : > { %v979_v56 = vpop.f32.mrb[10].mxu0 }
 0x5c6   : > { %v2108_v57 = vpop.f32.mrb[11].mxu0 }
 0x5d0   : > { %v1086_v58 = vpop.f32.mrb[12].mxu0 }
 0x5d1   : > { %1313 = vrot.lane.b32.xlu0 %v1086_v58, %s2452_s24  ;;  %v2119_v59 = vpop.f32.mrb[13].mxu0 }
 0x5d2   : > { %v1089_v60 = vpop.f32.mrb[14].mxu0 }
 0x5d3   : > { %v2120_v61 = vpop.f32.mrb[15].mxu0 }
 0x5f8   : > { %v1196_v0 = vpop.f32.mrb[16].mxu0 }
 0x5f9   : > { %1317 = vrot.lane.b32.xlu1 %v1196_v0, %s2453_s28  ;;  %v2131_v1 = vpop.f32.mrb[17].mxu0  ;;  %v2035_v0 = vld [vmem:[%s754_s18] ss:$0 sm:$0xff]  ;;  %s3013_s18 = sld [smem:[#allocation31_spill]] (!%p2036_p6) }
 0x5fa   : > { %v1199_v2 = vpop.f32.mrb[18].mxu0 }
 0x5fb   : > { %v2132_v4 = vpop.f32.mrb[19].mxu0 }
 0x600   : > { %v1306_v5 = vpop.f32.mrb[20].mxu0 }
 0x601   : > { %1321 = vrot.lane.b32.xlu0 %v1306_v5, %s2454_s12  ;;  %v2143_v6 = vpop.f32.mrb[21].mxu0 }
 0x602   : > { %v1309_v7 = vpop.f32.mrb[22].mxu0 }
 0x603   : > { %v2144_v8 = vpop.f32.mrb[23].mxu0  ;;  %v2455_v7 = vmov (!%p2036_p6), 0.0  }
 0x604   : > { %v1622_v8 = vstv (!%p2036_p6), %s1621_s20 }
 0x605   : > { %vm1623_vm9 = vcmp.eq.s32.totalorder (!%p2036_p6), %v2764_v43, %v1622_v8  ;;  %v2324_v43 = vld [vmem:[%s3013_s18 + $0x8] sm:$0xff] (!%p2036_p6)  }
 0x643   : > { %v1314_v9 = vpop.permute.xlu0 %1313 }
 0x644   : > { %v1324_v12 = vsel %vm874_vm3, %v976_v54, %v1314_v9  ;;  %v2037_v9 = vsel (!%p2036_p6), %vm1623_vm9, 1.0, %v2455_v7 }
 0x66b   : > { %v1318_v10 = vpop.permute.xlu1 %1317 }
 0x66c   : > { %v1326_v13 = vsel %vm1325_vm6, %v1324_v12, %v1318_v10 }
 0x673   : > { %v1322_v14 = vpop.permute.xlu0 %1321 }
 0x674   : > { %v1328_v15 = vsel %vm1327_vm7, %v1326_v13, %v1322_v14 }
 0x675   : > { %v1333_v16 = vpack.c.bf16 %v1328_v15, %v1328_v15 }
 0x677   : > { %2150 = vmatmul.mubr.msk.bf16.vlgmr.msra.gmra.mrb[12].mxu1 %vm774_vm1, %v1333_v16 }
 0x678   : > { %2177 = vmatprep.mubr.msk.bf16.mxu1 %vm2439_vm2, %v2438_v11  ;;  %2162 = vmatpush3.bf16.msra.mxu1 %v2291_v41 }
 0x679   : > { %2163 = vmatprep.subr.bf16.mxu1 %v2438_v11 }
 0x67c   : > { %2164 = vmatpush3.bf16.msra.mxu1 %v2292_v44 }
 0x67d   : > { %2165 = vmatprep.subr.bf16.mxu1 %v2438_v11 }
 0x680   : > { %2166 = vmatpush3.bf16.msra.mxu1 %v2293_v45 }
 0x681   : > { %2167 = vmatprep.subr.bf16.mxu1 %v2438_v11 }
 0x684   : > { %2168 = vmatpush3.bf16.msra.mxu1 %v2294_v46 }
 0x685   : > { %2169 = vmatprep.subr.bf16.mxu1 %v2438_v11 }
 0x688   : > { %2170 = vmatpush3.bf16.msra.mxu1 %v2295_v47 }
 0x689   : > { %2171 = vmatprep.subr.bf16.mxu1 %v2438_v11 }
 0x68c   : > { %2172 = vmatpush3.bf16.msra.mxu1 %v2296_v48 }
 0x68d   : > { %2173 = vmatprep.subr.bf16.mxu1 %v2438_v11 }
 0x690   : > { %2174 = vmatpush3.bf16.msra.mxu1 %v2297_v49 }
 0x691   : > { %2175 = vmatprep.subr.bf16.mxu1 %v2438_v11 }
 0x694   : > { %2176 = vmatpush3.bf16.msra.mxu1 %v2298_v50 }
 0x695   : > { %2186 = vmatprep.subr.bf16.mxu1 (!%p2036_p6), %v2455_v7 }
 0x74a   : > { %v1383_v17 = vpop.f32.mrb[12].mxu1 }
 0x74b   : > { %v1389_v19 = vadd.f32 %v1383_v17, %v2698_v3  ;;  %v2151_v20 = vpop.f32.mrb[13].mxu1  ;;  %v2289_v3 = vld [vmem:[%s2677_s2] sm:$0xff]  }
 0x74c   : > { %v1386_v21 = vpop.f32.mrb[14].mxu1  ;;  %2154 = vmatpush3.bf16.msra.mxu0 %v2289_v3  ;;  %v1779_v3 = vsub.s32 (!%p2036_p6), 0, %v2762_v42 }
 0x74d   : > { %v2814_v22 = vadd.f32 %v2019_v18, %v1389_v19  ;;  %v2152_v23 = vpop.f32.mrb[15].mxu1  ;;  %2155 = vmatprep.subr.bf16.mxu0 %v2438_v11  ;;  %v2323_v19 = vld [vmem:[%s3013_s18] sm:$0xff] (!%p2036_p6)  }
 0x74f   : > { %v1400_v24 = vsel %vm774_vm1, %v2814_v22, 0.0 }
 0x750   : > { %1401 = vadd.xlane.f32.xlu1 %v1400_v24  ;;  %2156 = vmatpush3.bf16.msra.mxu0 %v2290_v31  ;;  %v1699_v24 = vld [vmem:[%s3014_s1] sm:$0x1] (!%p2036_p6) }
 0x751   : > { %2181 = vmatprep.subr.mxu0 (!%p2036_p6), %v2455_v7 }
 0x7dd   : > { %v1402_v25 = vpop.xlane.xlu1 %1401 }
 0x7de   : > { %v1403_v26 = vmul.f32 0.03125, %v1402_v25 }
 0x7e0   : > { %v1404_v27 = vsub.f32 %v2814_v22, %v1403_v26  ;;  %v1700_v26 = vld [vmem:[%s3015_s27] sm:$0x1] (!%p2036_p6) }
 0x7e2   : > { %v1405_v29 = vmul.f32 %v1404_v27, %v1404_v27 }
 0x7e4   : > { %v1406_v30 = vsel %vm774_vm1, %v1405_v29, 0.0 }
 0x7e5   : > { %1407 = vadd.xlane.f32.xlu0 %v1406_v30 }
 0x872   : > { %v1408_v32 = vpop.xlane.xlu0 %1407 }
 0x873   : > { %v1409_v33 = vmul.f32 0.03125, %v1408_v32 }
 0x875   : > { %v1410_v34 = vadd.f32 1e-05, %v1409_v33 }
 0x877   : > { %2317 = vrsqrt.f32 %v1410_v34 }
 0x881   : > { %v2318_v35 = vpop.eup %2317 }
 0x882   : > { %v1412_v36 = vmul.f32 %v2318_v35, %v1404_v27 }
 0x884   : > { %v1419_v38 = vmul.f32 %v2020_v28, %v1412_v36 }
 0x886   : > { %v1426_v39 = vadd.f32 %v2021_v37, %v1419_v38 }
 0x888   : > { %v1431_v40 = vpack.c.bf16 %v1426_v39, %v1426_v39 }
 0x88a   : > { %2158 = vmatmul.mubr.msk.bf16.vlgmr.msra.gmra.mrb[24].mxu0 %vm774_vm1, %v1431_v40 }
 0x88b   : > { %2183 = vmatprep.mubr.msk.f32.mxu0 (!%p2036_p6), %vm2456_vm8, %v2455_v7 }
 0x95d   : > { %v1488_v52 = vpop.f32.mrb[24].mxu0 }
 0x95e   : > { %v1489_v53 = vadd.f32 %v2022_v51, %v1488_v52  ;;  %v2159_v54 = vpop.f32.mrb[25].mxu0 }
 0x95f   : > { %v1491_v55 = vpop.f32.mrb[26].mxu0 }
 0x960   : > { %v2026_v56 = vmul.f32 -1.702, %v1489_v53  ;;  %v2160_v57 = vpop.f32.mrb[27].mxu0 }
 0x962   : > { %v1496_v58 = vmul.f32 1.442695, %v2026_v56 }
 0x964   : > { %2319 = vpow2.f32 %v1496_v58 }
 0x96e   : > { %v2320_v59 = vpop.eup %2319 }
 0x96f   : > { %v1498_v60 = vadd.f32 1.0, %v2320_v59 }
 0x971   : > { %2321 = vrcp.f32 %v1498_v60 }
 0x97b   : > { %v2322_v11 = vpop.eup %2321 }
 0x97c   : > { %v1501_v61 = vmul.f32 %v2322_v11, %v1489_v53 }
 0x97e   : > { %v1518_v62 = vpack.c.bf16 %v1501_v61, %v1501_v61 }
 0x980   : > { %2178 = vmatmul.mubr.bf16.vlgmr.msra.gmra.mrb[16].mxu1 %v1518_v62 }
 0x981   : > { %2190 = vmatprep.mubr.msk.bf16.mxu1 (!%p2036_p6), %vm2456_vm8, %v2455_v7  ;;  %2187 = vmatpush3.bf16.msra.mxu1 (!%p2036_p6), %v2323_v19 }
 0x982   : > { %2188 = vmatprep.subr.bf16.mxu1 (!%p2036_p6), %v2455_v7 }
 0x985   : > { %2189 = vmatpush3.bf16.msra.mxu1 (!%p2036_p6), %v2324_v43 }
 0xa52   : > { %1620 = sbr.rel (%p2036_p6) target bundleno = 3391 (0xd3f), region = 96 }
 0xa53   : > { %v1601_v63 = vpop.f32.mrb[16].mxu1 }
 0xa54   : > { %v1607_v1 = vadd.f32 %v1601_v63, %v2814_v22  ;;  %v2179_v2 = vpop.f32.mrb[17].mxu1 }
 0xa55   : > { %v1604_v4 = vpop.f32.mrb[18].mxu1 }
 0xa56   : > { %v1615_v5 = vadd.f32 %v2035_v0, %v1607_v1  ;;  %v2180_v6 = vpop.f32.mrb[19].mxu1 }
 0xa58   : > { %1616 = vst.msk [vmem:[#allocation2] sm:$0xff] %vm774_vm1, %v1615_v5  ;;  %2182 = vmatpush3.msra.mxu0 (!%p2036_p6), %v1615_v5 }
 0xa59   : > { %2184 = vmatmul.mubr.msk.f32.vlgmr.msra.gmra.mrb[0].mxu0 %vm874_vm3, %v2037_v9 }
 0xb2c   : > { %v1695_v10 = vpop.f32.mrb[0].mxu0 }
 0xb2d   : > { %v2185_v12 = vpop.f32.mrb[1].mxu0  ;;  %v1702_v13 = vsel %vm1701_vm10, %v1695_v10, 0.0 }
 0xb2e   : > { %1703 = vadd.xlane.f32.xlu0 %v1702_v13 }
 0xbbb   : > { %v1704_v14 = vpop.xlane.xlu0 %1703 }
 0xbbc   : > { %v1705_v15 = vmul.f32 0.03125, %v1704_v14 }
 0xbbe   : > { %v1706_v16 = vsub.f32 %v1695_v10, %v1705_v15 }
 0xbc0   : > { %v1707_v17 = vmul.f32 %v1706_v16, %v1706_v16 }
 0xbc2   : > { %v1708_v18 = vsel %vm1701_vm10, %v1707_v17, 0.0 }
 0xbc3   : > { %1709 = vadd.xlane.f32.xlu0 %v1708_v18 }
 0xc50   : > { %v1710_v20 = vpop.xlane.xlu0 %1709 }
 0xc51   : > { %v1711_v21 = vmul.f32 0.03125, %v1710_v20 }
 0xc53   : > { %v1712_v22 = vadd.f32 1e-05, %v1711_v21 }
 0xc55   : > { %2325 = vrsqrt.f32 %v1712_v22 }
 0xc5f   : > { %v2326_v23 = vpop.eup %2325 }
 0xc60   : > { %v1714_v25 = vmul.f32 %v2326_v23, %v1706_v16 }
 0xc62   : > { %v1715_v27 = vmul.f32 %v1714_v25, %v1699_v24 }
 0xc64   : > { %v1716_v29 = vadd.f32 %v1715_v27, %v1700_v26 }
 0xc66   : > { %v1721_v30 = vpack.c.bf16 %v1716_v29, %v1716_v29 }
 0xc68   : > { %2191 = vmatmul.mubr.msk.bf16.vlgmr.msra.gmra.mrb[0].mxu1 %vm774_vm1, %v1721_v30 }
 0xd3b   : > { %v1771_v31 = vpop.f32.mrb[0].mxu1 }
 0xd3c   : > { %v1780_v32 = vrot.slane %v1771_v31, %v1779_v3  ;;  %v2192_v33 = vpop.f32.mrb[1].mxu1 }
 0xd3d   : > { %v1774_v34 = vpop.f32.mrb[2].mxu1 }
 0xd3e   : > { %1781 = vst [vmem:[%s706_s15] sm:$0xff] %v1780_v32  ;;  %v2193_v35 = vpop.f32.mrb[3].mxu1 }
 0xd3f PF: > { %s3016_s17 = sld [smem:[#allocation12_spill]]  ;;  %s3019_s19 = sld [smem:[#allocation32_spill]] }
 0xd40   : > { %s3017_s30 = sld [smem:[#allocation10_spill]]  ;;  %s1796_s20 = sshll.u32 %s706_s15, 4  ;;  %s1797_s20 = int_to_ptr.vmem [resolvable:$true] %s1796_s20 }
 0xd41   : > { %s2339_s24 = scalar_lea.vmem %s1797_s20, 128  ;;  %s2457_s28 = smov [#allocation5]  }
 0xd42   : > { %p2340_p7 = scmp.ne.s32.totalorder %s1797_s20, %s2339_s24  ;;  %s2343_s12 = sshll.u32 %s2457_s28, 4  ;;  %s2344_s12 = int_to_ptr.vmem [resolvable:$false] %s2343_s12 }
 0xd43   : > { %s2345_s4 = scalar_lea.vmem %s2344_s12, 256  ;;  %p2346_p11 = scmp.lt.s32.totalorder %s1797_s20, %s2344_s12 }
 0xd44   : > { %p2341_p9 = pnand %p2340_p7, %p2605_p8  ;;  %p2347_p12 = scmp.lt.s32.totalorder %s2345_s4, %s2339_s24 }
 0xd45   : > { %s2043_s5 = sshll.u32 %s3016_s17, 7  ;;  %s3020_s7 = smov %s3019_s19 }
 0xd46   : > { %s2885_s23 = scalar_lea.hbm %s3019_s19, %s2043_s5  ;;  %s3021_s21 = sand.u32 1, %s3017_s30  }
 0xd47   : > { %s1783_s29 = scalar_lea.sflag [#allocation6], %s3021_s21  ;;  %p2342_p10 = pneg %p2341_p9 }
 0xd48   : > { %p2348_p13 = por %p2347_p12, %p2346_p11 }
 0xd4a   : > { %p2349_p1 = pnand %p2348_p13, %p2342_p10 }
 0xd4c   : > { %2352 = shalt.err (!%p2349_p1)
}
 0xd4d   : > { %s2353_s26 = scalar_lea.hbm %s2885_s23, 128  ;;  %s2357_s16 = scalar_lea.hbm %s3020_s7, 256 }
 0xd4e   : > { %p2354_p2 = scmp.ne.s32.totalorder %s2885_s23, %s2353_s26  ;;  %p2358_p5 = scmp.lt.u32.totalorder %s2885_s23, %s3020_s7 }
 0xd4f   : > { %p2359_p6 = scmp.lt.u32.totalorder %s2357_s16, %s2353_s26  ;;  %p2361_p9 = scmp.lt.u32.totalorder %s2353_s26, %s2885_s23 }
 0xd50   : > { %p2355_p3 = pnand %p2354_p2, %p2605_p8 }
 0xd51   : > { %p2360_p7 = por %p2359_p6, %p2358_p5 }
 0xd52   : > { %p2356_p4 = pneg %p2355_p3 }
 0xd53   : > { %p2362_p10 = por %p2361_p9, %p2360_p7 }
 0xd55   : > { %p2363_p11 = pnand %p2362_p10, %p2356_p4 }
 0xd57   : > { %2366 = shalt.err (!%p2363_p11)
}
 0xd58   : > { %2194 = dma.vmem_to_hbm [thread:$0]  (%p2605_p8), %s1797_s20, 128, %s2885_s23, %s1783_s29  }
 0xd59 PF: > { %s3022_s17 = sld [smem:[#allocation15_spill]]  ;;  %s3023_s30 = sld [smem:[#allocation9_spill]] }
 0xd5f   : > { %p2200_p12 = scmp.ge.s32.totalorder %s3022_s17, 2  ;;  %s1808_s2 = sand.u32 1, %s3023_s30  }
 0xd60   : > { %s1809_s0 = scalar_lea.sflag [#allocation6], %s1808_s2 }
 0xd61   : > { %p2197_p13 = pnand %p2200_p12, %p2615_p0 }
 0xd63   : > { %2402 = dma.done.wait (!%p2197_p13), %s1809_s0, 128  }
 0xd64   : > { %2404 = vsyncadd (!%p2197_p13), %s1809_s0, 4294967168  ;;  %s37_s12 = sadd.s32 1, %s3022_s17   ;;  %s3025_s19 = sld [smem:[#allocation10_spill]] }
 0xd65   : > { %p34_p1 = scmp.ge.s32.totalorder %s37_s12, 6   ;;  %s3026_s1 = sld [smem:[#allocation11_spill]] }
 0xd66   : > { %s3027_s20 = sld [smem:[#allocation20_spill]]  ;;  %s3028_s21 = sld [smem:[#allocation13_spill]] }
 0xd67   : > { %s3029_s22 = sld [smem:[#allocation14_spill]]  ;;  %s3030_s2 = sld [smem:[#allocation16_spill]] }
 0xd68   : > { %s3031_s23 = sld [smem:[#allocation18_spill]]  ;;  %36 = sbr.rel (!%p34_p1) target bundleno = 29 (0x1d), region = 167 }
 0xd6f   :  { %1814 = vsyncpa [#allocation6], 1 }
 0xd70   :  { %1816 = vsyncpa [#allocation6 + $0x1], 1 }

</bundles_post_ra>
